<compile_context>
chip_gen: v7x
topology: tpu7x:2x2x1
jax: 0.10.0
libtpu: 0.0.40
codegen_flags: <defaults>
</compile_context>

<pallas_src>
import numpy as np
import jax
import jax.numpy as jnp
from jax.experimental import pallas as pl
from jax.experimental.pallas import tpu as pltpu  # noqa: F401  (TPU backend)


# ----------------------------------------------------------------------------
# Fused kernel: the whole RealNVP forward in one invocation.
#   z stays in original-input column order the whole time; the per-step
#   parameter scatters (done at pack time) account for all permutations.
# ----------------------------------------------------------------------------
def realnvp_fused_kernel(x_ref, w1_ref, w2_ref, w3_ref, prm_ref, out_ref, ld_ref):
    S = w1_ref.shape[0]                  # 2 * n_flow half-flow steps
    B, ndim = out_ref.shape
    hidden = w1_ref.shape[2]             # natural (un-padded) hidden width

    z = x_ref[...]                       # (B, ndim) activation, VMEM resident
    ld = jnp.zeros((B, ndim), jnp.float32)

    # S is a small static constant -> fully unrolled, all weight indices static.
    for s in range(S):
        prm = prm_ref[s]                             # (16, 2*ndim) packed rows
        b1, g1, be1 = prm[0:1, :hidden], prm[1:2, :hidden], prm[2:3, :hidden]
        b2, g2, be2 = prm[3:4, :hidden], prm[4:5, :hidden], prm[5:6, :hidden]
        b3cat = prm[6:7, :]                          # (1, 2*ndim), 0 on a-lanes
        loc = prm[7:8, :ndim]                        # ActNorm loc (scalar bcast)
        an_scale = prm[8:9, :ndim]                   # exp(-log_scale_inv)
        neg_lsi = prm[9:10, :ndim]                   # -log_scale_inv (per lane)

        # ---- ActNorm (scalar loc / scale => permutation invariant) ----
        y = (z + loc) * an_scale

        # ---- AffineCoupling net. W1 rows on the b-lanes are zero, so the
        #      full-width (lane-dense) activation is a valid input. ----
        h = jnp.dot(y, w1_ref[s], preferred_element_type=jnp.float32) + b1
        h = jnp.where(h >= 0.0, h, 0.01 * h)                     # LeakyReLU(0.01)
        m = jnp.mean(h, axis=0, keepdims=True)                   # BatchNorm1d
        v = jnp.mean((h - m) * (h - m), axis=0, keepdims=True)   # (train, eps=0.01)
        h = (h - m) * jax.lax.rsqrt(v + 0.01) * g1 + be1

        h = jnp.dot(h, w2_ref[s], preferred_element_type=jnp.float32) + b2
        h = jnp.where(h >= 0.0, h, 0.01 * h)
        m = jnp.mean(h, axis=0, keepdims=True)
        v = jnp.mean((h - m) * (h - m), axis=0, keepdims=True)
        h = (h - m) * jax.lax.rsqrt(v + 0.01) * g2 + be2

        # ZeroFC with exp(3*zs) pre-folded; output columns already scattered to
        # this step's kernel-lane positions at pack time:
        #   lanes [0, ndim)       -> log_s0 on the b-lanes, 0 on the a-lanes
        #   lanes [ndim, 2*ndim)  -> t      on the b-lanes, 0 on the a-lanes
        net = jnp.dot(h, w3_ref[s], preferred_element_type=jnp.float32) + b3cat
        log_s = jnp.tanh(net[:, :ndim])              # exactly 0 on a-lanes
        t = net[:, ndim:]                            # exactly 0 on a-lanes

        # b-lanes: (y + t) * exp(tanh(log_s0)); a-lanes pass through exactly.
        z = (y + t) * jnp.exp(log_s)
        # coupling logdet (b-lanes of log_s) + ActNorm logdet (ndim * -lsi)
        ld = ld + log_s + neg_lsi

    out_ref[...] = z
    ld_ref[...] = jnp.sum(ld, axis=1, keepdims=True)


# ----------------------------------------------------------------------------
# One-time parameter packing. Folds exp(3*zs) and exp(-lsi), and scatters
# W1 rows / W3 columns to the kernel-lane positions implied by the cumulative
# permutation of each step (reverse / reverse∘orders[i]).
# ----------------------------------------------------------------------------
def pack_realnvp_params(flow_params, orders, ndim):
    assert ndim % 2 == 0, "even ndim required"
    hidden = int(np.asarray(flow_params[0][0]['w1']).shape[1])
    half_b = ndim // 2
    half_a = ndim - half_b
    n_flow = len(flow_params)

    rev = np.arange(ndim - 1, -1, -1)
    step_perms = []
    for i in range(n_flow):
        step_perms.append(rev)                                   # after half-flow A
        step_perms.append(ndim - 1 - np.asarray(orders[i]))      # reverse ∘ orders[i]

    # sigma[s][j] = kernel lane (original-input column) holding true column j
    # at the start of step s; sigma[S] is the final output permutation.
    sigmas = [np.arange(ndim)]
    for p in step_perms:
        sigmas.append(sigmas[-1][p])

    params_flat = [p for pair in flow_params for p in pair]
    w1s, w2s, w3s, prs = [], [], [], []
    for s, p in enumerate(params_flat):
        sig = sigmas[s]
        a_lanes = sig[:half_a]                     # kernel lanes of the a-half
        b_lanes = sig[half_a:]                     # kernel lanes of the b-half

        w1k = np.zeros((ndim, hidden), np.float32)
        w1k[a_lanes, :] = np.asarray(p['w1'], np.float32)
        w2k = np.asarray(p['w2'], np.float32)

        zsc = np.exp(3.0 * np.asarray(p['zs'], np.float32))[0]   # (2*half_b,)
        w3e = np.asarray(p['w3'], np.float32) * zsc[None, :]
        b3e = np.asarray(p['b3'], np.float32)[0] * zsc
        w3k = np.zeros((hidden, 2 * ndim), np.float32)
        w3k[:, b_lanes] = w3e[:, :half_b]                         # log_s0 part
        w3k[:, ndim + b_lanes] = w3e[:, half_b:]                  # t part
        b3k = np.zeros((2 * ndim,), np.float32)
        b3k[b_lanes] = b3e[:half_b]
        b3k[ndim + b_lanes] = b3e[half_b:]

        loc = float(np.asarray(p['loc'])[0, 0])
        lsi = float(np.asarray(p['lsi'])[0, 0])
        rows = np.zeros((16, 2 * ndim), np.float32)
        rows[0, :hidden] = np.asarray(p['b1'], np.float32)[0]
        rows[1, :hidden] = np.asarray(p['g1'], np.float32)[0]
        rows[2, :hidden] = np.asarray(p['be1'], np.float32)[0]
        rows[3, :hidden] = np.asarray(p['b2'], np.float32)[0]
        rows[4, :hidden] = np.asarray(p['g2'], np.float32)[0]
        rows[5, :hidden] = np.asarray(p['be2'], np.float32)[0]
        rows[6, :] = b3k
        rows[7, :ndim] = loc                     # ActNorm loc
        rows[8, :ndim] = np.exp(-lsi)            # ActNorm scale = exp(-lsi)
        rows[9, :ndim] = -lsi                    # per-lane logdet contribution

        w1s.append(w1k); w2s.append(w2k); w3s.append(w3k); prs.append(rows)

    return dict(
        w1=jnp.asarray(np.stack(w1s)),           # (S, ndim, hidden)
        w2=jnp.asarray(np.stack(w2s)),           # (S, hidden, hidden)
        w3=jnp.asarray(np.stack(w3s)),           # (S, hidden, 2*ndim)
        prm=jnp.asarray(np.stack(prs)),          # (S, 16, 2*ndim)
        out_perm=jnp.asarray(sigmas[-1], jnp.int32),   # final cumulative perm
    )


# ----------------------------------------------------------------------------
# Fused forward wrapper: single grid-less pallas_call for the whole forward;
# the one remaining (exact) cumulative permutation is applied once here.
# ----------------------------------------------------------------------------
def _realnvp_forward_fused(x, w1, w2, w3, prm, out_perm):
    B, ndim = x.shape
    out, ld = pl.pallas_call(
        realnvp_fused_kernel,
        out_shape=(jax.ShapeDtypeStruct((B, ndim), jnp.float32),
                   jax.ShapeDtypeStruct((B, 1), jnp.float32)),
    )(x, w1, w2, w3, prm)
    return jnp.take(out, out_perm, axis=1), ld[:, 0]


realnvp_forward_fused = jax.jit(_realnvp_forward_fused)


# ----------------------------------------------------------------------------
# Pure-JAX reference of the original (unfused, unpacked) math, for verification
# ----------------------------------------------------------------------------
def half_flow_ref(x, p):
    hi = jax.lax.Precision.HIGHEST
    ndim = x.shape[1]
    half_b = ndim // 2
    half_a = ndim - half_b
    y = (x + p['loc']) * jnp.exp(-p['lsi'])
    det_an = ndim * (-p['lsi'][0, 0])
    a, b = y[:, :half_a], y[:, half_a:]
    h = jnp.dot(a, p['w1'], precision=hi) + p['b1']
    h = jnp.where(h >= 0, h, 0.01 * h)
    m = h.mean(0, keepdims=True); v = ((h - m) ** 2).mean(0, keepdims=True)
    h = (h - m) / jnp.sqrt(v + 0.01) * p['g1'] + p['be1']
    h = jnp.dot(h, p['w2'], precision=hi) + p['b2']
    h = jnp.where(h >= 0, h, 0.01 * h)
    m = h.mean(0, keepdims=True); v = ((h - m) ** 2).mean(0, keepdims=True)
    h = (h - m) / jnp.sqrt(v + 0.01) * p['g2'] + p['be2']
    net = (jnp.dot(h, p['w3'], precision=hi) + p['b3']) * jnp.exp(3.0 * p['zs'])
    log_s = jnp.tanh(net[:, :half_b]); t = net[:, half_b:]
    out_b = (b + t) * jnp.exp(log_s)
    return jnp.concatenate([a, out_b], axis=1), jnp.sum(log_s, axis=1) + det_an


def realnvp_forward_ref(x, flow_params, orders):
    out = x
    logdet = jnp.zeros((x.shape[0],), jnp.float32)
    for i, (pA, pB) in enumerate(flow_params):
        o, d1 = half_flow_ref(out, pA)
        o = o[:, ::-1]
        o, d2 = half_flow_ref(o, pB)
        o = o[:, ::-1]
        logdet = logdet + d1 + d2
        out = o[:, orders[i]]
    return out, logdet


# ----------------------------------------------------------------------------
# Deterministic parameter construction (shapes follow the PyTorch __init__)
# ----------------------------------------------------------------------------
def init_half_flow_params(key, ndim, seqfrac):
    half_a = ndim - ndim // 2
    hidden = int(ndim / (2 * seqfrac))
    out3 = 2 * (ndim // 2)
    ks = jax.random.split(key, 8)
    f32 = jnp.float32
    # TODO(synk): PyTorch's ActNorm lazily initializes loc/log_scale_inv from the
    # first batch (data-dependent) and BatchNorm1d updates running stats; here
    # ActNorm is treated as already initialized and BatchNorm uses batch stats
    # (training mode) without running-stat updates.
    return dict(
        loc=(jax.random.normal(ks[0], (1, 1), f32) * 0.1),
        lsi=(jax.random.normal(ks[1], (1, 1), f32) * 0.1),
        # nn.Linear weights stored pre-transposed to (in, out); init N(0, 0.05)
        w1=(jax.random.normal(ks[2], (hidden, half_a), f32) * 0.05).T,
        b1=jnp.zeros((1, hidden), f32),
        g1=jnp.ones((1, hidden), f32),     # BatchNorm1d affine weight
        be1=jnp.zeros((1, hidden), f32),   # BatchNorm1d affine bias
        w2=(jax.random.normal(ks[3], (hidden, hidden), f32) * 0.05).T,
        b2=jnp.zeros((1, hidden), f32),
        g2=jnp.ones((1, hidden), f32),
        be2=jnp.zeros((1, hidden), f32),
        # ZeroFC params (PyTorch inits these to zero -> identity coupling; use
        # small deterministic values so the kernel compute path is exercised)
        w3=(jax.random.normal(ks[4], (out3, hidden), f32) * 0.05).T,
        b3=(jax.random.normal(ks[5], (1, out3), f32) * 0.01),
        zs=(jax.random.normal(ks[6], (1, out3), f32) * 0.1),
    )


if __name__ == "__main__":
    ndim, n_flow, seqfrac, batch = 128, 2, 4, 8

    key = jax.random.PRNGKey(0)
    kx, kp = jax.random.split(key)
    x = jax.random.normal(kx, (batch, ndim), jnp.float32)

    # per-block random permutations, exactly as the PyTorch module builds them
    orders = [np.random.RandomState(seed=i).permutation(ndim) for i in range(n_flow)]

    flow_params = []
    pk = kp
    for _ in range(n_flow):
        pk, kA, kB = jax.random.split(pk, 3)
        flow_params.append((init_half_flow_params(kA, ndim, seqfrac),
                            init_half_flow_params(kB, ndim, seqfrac)))

    packed = pack_realnvp_params(flow_params, orders, ndim)   # one-time preprocessing

    out, logdet = realnvp_forward_fused(x, packed['w1'], packed['w2'],
                                        packed['w3'], packed['prm'],
                                        packed['out_perm'])
    out, logdet = jax.block_until_ready((out, logdet))

    out_ref, logdet_ref = realnvp_forward_ref(x, flow_params, orders)

    assert out.shape == (batch, ndim) and logdet.shape == (batch,)
    # Loose tolerance is intentional: in-kernel dots use default MXU f32
    # precision while the reference uses Precision.HIGHEST.
    assert bool(jnp.allclose(out, out_ref, rtol=2e-2, atol=2e-2))
    assert bool(jnp.allclose(logdet, logdet_ref, rtol=2e-2, atol=2e-2))
    print("KERNEL_OK")
</pallas_src>

<mosaic_0001>
module attributes {stable_mosaic.version = 11 : i64} {
  func.func @realnvp_fused_kernel(%arg0: memref<8x128xf32, #tpu.memory_space<vmem>>, %arg1: memref<4x128x16xf32, #tpu.memory_space<vmem>>, %arg2: memref<4x16x16xf32, #tpu.memory_space<vmem>>, %arg3: memref<4x16x256xf32, #tpu.memory_space<vmem>>, %arg4: memref<4x16x256xf32, #tpu.memory_space<vmem>>, %arg5: memref<8x128xf32, #tpu.memory_space<vmem>>, %arg6: memref<8x1xf32, #tpu.memory_space<vmem>>) attributes {dimension_semantics = [], scalar_prefetch = 0 : i64, scratch_operands = 0 : i64, tpu.core_type = #tpu.core_type<tc>} {
    %c0 = arith.constant 0 : index
    %c0_0 = arith.constant 0 : index
    %0 = vector.load %arg0[%c0, %c0_0] : memref<8x128xf32, #tpu.memory_space<vmem>>, vector<8x128xf32>
    %cst = arith.constant 0.000000e+00 : f32
    %1 = vector.broadcast %cst : f32 to vector<8x128xf32>
    %c0_1 = arith.constant 0 : index
    %c0_2 = arith.constant 0 : index
    %c0_3 = arith.constant 0 : index
    %2 = vector.load %arg4[%c0_1, %c0_2, %c0_3] : memref<4x16x256xf32, #tpu.memory_space<vmem>>, vector<1x16x256xf32>
    %3 = vector.shape_cast %2 : vector<1x16x256xf32> to vector<16x256xf32>
    %4 = vector.extract_strided_slice %3 {offsets = [0, 0], sizes = [1, 16], strides = [1, 1]} : vector<16x256xf32> to vector<1x16xf32>
    %5 = vector.extract_strided_slice %3 {offsets = [1, 0], sizes = [1, 16], strides = [1, 1]} : vector<16x256xf32> to vector<1x16xf32>
    %6 = vector.extract_strided_slice %3 {offsets = [2, 0], sizes = [1, 16], strides = [1, 1]} : vector<16x256xf32> to vector<1x16xf32>
    %7 = vector.extract_strided_slice %3 {offsets = [3, 0], sizes = [1, 16], strides = [1, 1]} : vector<16x256xf32> to vector<1x16xf32>
    %8 = vector.extract_strided_slice %3 {offsets = [4, 0], sizes = [1, 16], strides = [1, 1]} : vector<16x256xf32> to vector<1x16xf32>
    %9 = vector.extract_strided_slice %3 {offsets = [5, 0], sizes = [1, 16], strides = [1, 1]} : vector<16x256xf32> to vector<1x16xf32>
    %10 = vector.extract_strided_slice %3 {offsets = [6, 0], sizes = [1, 256], strides = [1, 1]} : vector<16x256xf32> to vector<1x256xf32>
    %11 = vector.extract_strided_slice %3 {offsets = [7, 0], sizes = [1, 128], strides = [1, 1]} : vector<16x256xf32> to vector<1x128xf32>
    %12 = vector.extract_strided_slice %3 {offsets = [8, 0], sizes = [1, 128], strides = [1, 1]} : vector<16x256xf32> to vector<1x128xf32>
    %13 = vector.extract_strided_slice %3 {offsets = [9, 0], sizes = [1, 128], strides = [1, 1]} : vector<16x256xf32> to vector<1x128xf32>
    %14 = vector.broadcast %11 : vector<1x128xf32> to vector<8x128xf32>
    %15 = arith.addf %0, %14 : vector<8x128xf32>
    %16 = vector.broadcast %12 : vector<1x128xf32> to vector<8x128xf32>
    %17 = arith.mulf %15, %16 : vector<8x128xf32>
    %c0_4 = arith.constant 0 : index
    %c0_5 = arith.constant 0 : index
    %c0_6 = arith.constant 0 : index
    %18 = vector.load %arg1[%c0_4, %c0_5, %c0_6] : memref<4x128x16xf32, #tpu.memory_space<vmem>>, vector<1x128x16xf32>
    %19 = vector.shape_cast %18 : vector<1x128x16xf32> to vector<128x16xf32>
    %cst_7 = arith.constant dense<0.000000e+00> : vector<8x16xf32>
    %20 = tpu.matmul %17, %19, %cst_7 {dimension_numbers = #tpu.dot_dimension_numbers<[1], [0], [0], [1], [0, 0, 1, 1], [], []>} : vector<8x128xf32>, vector<128x16xf32>, vector<8x16xf32> -> vector<8x16xf32>
    %21 = vector.broadcast %4 : vector<1x16xf32> to vector<8x16xf32>
    %22 = arith.addf %20, %21 : vector<8x16xf32>
    %cst_8 = arith.constant 0.000000e+00 : f32
    %23 = vector.broadcast %cst_8 : f32 to vector<8x16xf32>
    %24 = arith.cmpf oge, %22, %23 : vector<8x16xf32>
    %cst_9 = arith.constant 0.00999999977 : f32
    %25 = vector.broadcast %cst_9 : f32 to vector<8x16xf32>
    %26 = arith.mulf %25, %22 : vector<8x16xf32>
    %27 = arith.select %24, %22, %26 : vector<8x16xi1>, vector<8x16xf32>
    %cst_10 = arith.constant dense<0.000000e+00> : vector<16xf32>
    %28 = vector.multi_reduction <add>, %27, %cst_10 [0] : vector<8x16xf32> to vector<16xf32>
    %29 = vector.shape_cast %28 : vector<16xf32> to vector<1x16xf32>
    %cst_11 = arith.constant 8.000000e+00 : f32
    %30 = vector.broadcast %cst_11 : f32 to vector<1x16xf32>
    %31 = arith.divf %29, %30 : vector<1x16xf32>
    %32 = vector.broadcast %31 : vector<1x16xf32> to vector<8x16xf32>
    %33 = arith.subf %27, %32 : vector<8x16xf32>
    %34 = vector.broadcast %31 : vector<1x16xf32> to vector<8x16xf32>
    %35 = arith.subf %27, %34 : vector<8x16xf32>
    %36 = arith.mulf %33, %35 : vector<8x16xf32>
    %cst_12 = arith.constant dense<0.000000e+00> : vector<16xf32>
    %37 = vector.multi_reduction <add>, %36, %cst_12 [0] : vector<8x16xf32> to vector<16xf32>
    %38 = vector.shape_cast %37 : vector<16xf32> to vector<1x16xf32>
    %cst_13 = arith.constant 8.000000e+00 : f32
    %39 = vector.broadcast %cst_13 : f32 to vector<1x16xf32>
    %40 = arith.divf %38, %39 : vector<1x16xf32>
    %41 = vector.broadcast %31 : vector<1x16xf32> to vector<8x16xf32>
    %42 = arith.subf %27, %41 : vector<8x16xf32>
    %cst_14 = arith.constant 0.00999999977 : f32
    %43 = vector.broadcast %cst_14 : f32 to vector<1x16xf32>
    %44 = arith.addf %40, %43 : vector<1x16xf32>
    %45 = math.rsqrt %44 : vector<1x16xf32>
    %46 = vector.broadcast %45 : vector<1x16xf32> to vector<8x16xf32>
    %47 = arith.mulf %42, %46 : vector<8x16xf32>
    %48 = vector.broadcast %5 : vector<1x16xf32> to vector<8x16xf32>
    %49 = arith.mulf %47, %48 : vector<8x16xf32>
    %50 = vector.broadcast %6 : vector<1x16xf32> to vector<8x16xf32>
    %51 = arith.addf %49, %50 : vector<8x16xf32>
    %c0_15 = arith.constant 0 : index
    %c0_16 = arith.constant 0 : index
    %c0_17 = arith.constant 0 : index
    %52 = vector.load %arg2[%c0_15, %c0_16, %c0_17] : memref<4x16x16xf32, #tpu.memory_space<vmem>>, vector<1x16x16xf32>
    %53 = vector.shape_cast %52 : vector<1x16x16xf32> to vector<16x16xf32>
    %cst_18 = arith.constant dense<0.000000e+00> : vector<8x16xf32>
    %54 = tpu.matmul %51, %53, %cst_18 {dimension_numbers = #tpu.dot_dimension_numbers<[1], [0], [0], [1], [0, 0, 1, 1], [], []>} : vector<8x16xf32>, vector<16x16xf32>, vector<8x16xf32> -> vector<8x16xf32>
    %55 = vector.broadcast %7 : vector<1x16xf32> to vector<8x16xf32>
    %56 = arith.addf %54, %55 : vector<8x16xf32>
    %cst_19 = arith.constant 0.000000e+00 : f32
    %57 = vector.broadcast %cst_19 : f32 to vector<8x16xf32>
    %58 = arith.cmpf oge, %56, %57 : vector<8x16xf32>
    %cst_20 = arith.constant 0.00999999977 : f32
    %59 = vector.broadcast %cst_20 : f32 to vector<8x16xf32>
    %60 = arith.mulf %59, %56 : vector<8x16xf32>
    %61 = arith.select %58, %56, %60 : vector<8x16xi1>, vector<8x16xf32>
    %cst_21 = arith.constant dense<0.000000e+00> : vector<16xf32>
    %62 = vector.multi_reduction <add>, %61, %cst_21 [0] : vector<8x16xf32> to vector<16xf32>
    %63 = vector.shape_cast %62 : vector<16xf32> to vector<1x16xf32>
    %cst_22 = arith.constant 8.000000e+00 : f32
    %64 = vector.broadcast %cst_22 : f32 to vector<1x16xf32>
    %65 = arith.divf %63, %64 : vector<1x16xf32>
    %66 = vector.broadcast %65 : vector<1x16xf32> to vector<8x16xf32>
    %67 = arith.subf %61, %66 : vector<8x16xf32>
    %68 = vector.broadcast %65 : vector<1x16xf32> to vector<8x16xf32>
    %69 = arith.subf %61, %68 : vector<8x16xf32>
    %70 = arith.mulf %67, %69 : vector<8x16xf32>
    %cst_23 = arith.constant dense<0.000000e+00> : vector<16xf32>
    %71 = vector.multi_reduction <add>, %70, %cst_23 [0] : vector<8x16xf32> to vector<16xf32>
    %72 = vector.shape_cast %71 : vector<16xf32> to vector<1x16xf32>
    %cst_24 = arith.constant 8.000000e+00 : f32
    %73 = vector.broadcast %cst_24 : f32 to vector<1x16xf32>
    %74 = arith.divf %72, %73 : vector<1x16xf32>
    %75 = vector.broadcast %65 : vector<1x16xf32> to vector<8x16xf32>
    %76 = arith.subf %61, %75 : vector<8x16xf32>
    %cst_25 = arith.constant 0.00999999977 : f32
    %77 = vector.broadcast %cst_25 : f32 to vector<1x16xf32>
    %78 = arith.addf %74, %77 : vector<1x16xf32>
    %79 = math.rsqrt %78 : vector<1x16xf32>
    %80 = vector.broadcast %79 : vector<1x16xf32> to vector<8x16xf32>
    %81 = arith.mulf %76, %80 : vector<8x16xf32>
    %82 = vector.broadcast %8 : vector<1x16xf32> to vector<8x16xf32>
    %83 = arith.mulf %81, %82 : vector<8x16xf32>
    %84 = vector.broadcast %9 : vector<1x16xf32> to vector<8x16xf32>
    %85 = arith.addf %83, %84 : vector<8x16xf32>
    %c0_26 = arith.constant 0 : index
    %c0_27 = arith.constant 0 : index
    %c0_28 = arith.constant 0 : index
    %86 = vector.load %arg3[%c0_26, %c0_27, %c0_28] : memref<4x16x256xf32, #tpu.memory_space<vmem>>, vector<1x16x256xf32>
    %87 = vector.shape_cast %86 : vector<1x16x256xf32> to vector<16x256xf32>
    %cst_29 = arith.constant dense<0.000000e+00> : vector<8x256xf32>
    %88 = tpu.matmul %85, %87, %cst_29 {dimension_numbers = #tpu.dot_dimension_numbers<[1], [0], [0], [1], [0, 0, 1, 1], [], []>} : vector<8x16xf32>, vector<16x256xf32>, vector<8x256xf32> -> vector<8x256xf32>
    %89 = vector.broadcast %10 : vector<1x256xf32> to vector<8x256xf32>
    %90 = arith.addf %88, %89 : vector<8x256xf32>
    %91 = vector.extract_strided_slice %90 {offsets = [0, 0], sizes = [8, 128], strides = [1, 1]} : vector<8x256xf32> to vector<8x128xf32>
    %92 = math.tanh %91 : vector<8x128xf32>
    %93 = vector.extract_strided_slice %90 {offsets = [0, 128], sizes = [8, 128], strides = [1, 1]} : vector<8x256xf32> to vector<8x128xf32>
    %94 = arith.addf %17, %93 : vector<8x128xf32>
    %95 = math.exp %92 : vector<8x128xf32>
    %96 = arith.mulf %94, %95 : vector<8x128xf32>
    %97 = arith.addf %1, %92 : vector<8x128xf32>
    %98 = vector.broadcast %13 : vector<1x128xf32> to vector<8x128xf32>
    %99 = arith.addf %97, %98 : vector<8x128xf32>
    %c1 = arith.constant 1 : index
    %c0_30 = arith.constant 0 : index
    %c0_31 = arith.constant 0 : index
    %100 = vector.load %arg4[%c1, %c0_30, %c0_31] : memref<4x16x256xf32, #tpu.memory_space<vmem>>, vector<1x16x256xf32>
    %101 = vector.shape_cast %100 : vector<1x16x256xf32> to vector<16x256xf32>
    %102 = vector.extract_strided_slice %101 {offsets = [0, 0], sizes = [1, 16], strides = [1, 1]} : vector<16x256xf32> to vector<1x16xf32>
    %103 = vector.extract_strided_slice %101 {offsets = [1, 0], sizes = [1, 16], strides = [1, 1]} : vector<16x256xf32> to vector<1x16xf32>
    %104 = vector.extract_strided_slice %101 {offsets = [2, 0], sizes = [1, 16], strides = [1, 1]} : vector<16x256xf32> to vector<1x16xf32>
    %105 = vector.extract_strided_slice %101 {offsets = [3, 0], sizes = [1, 16], strides = [1, 1]} : vector<16x256xf32> to vector<1x16xf32>
    %106 = vector.extract_strided_slice %101 {offsets = [4, 0], sizes = [1, 16], strides = [1, 1]} : vector<16x256xf32> to vector<1x16xf32>
    %107 = vector.extract_strided_slice %101 {offsets = [5, 0], sizes = [1, 16], strides = [1, 1]} : vector<16x256xf32> to vector<1x16xf32>
    %108 = vector.extract_strided_slice %101 {offsets = [6, 0], sizes = [1, 256], strides = [1, 1]} : vector<16x256xf32> to vector<1x256xf32>
    %109 = vector.extract_strided_slice %101 {offsets = [7, 0], sizes = [1, 128], strides = [1, 1]} : vector<16x256xf32> to vector<1x128xf32>
    %110 = vector.extract_strided_slice %101 {offsets = [8, 0], sizes = [1, 128], strides = [1, 1]} : vector<16x256xf32> to vector<1x128xf32>
    %111 = vector.extract_strided_slice %101 {offsets = [9, 0], sizes = [1, 128], strides = [1, 1]} : vector<16x256xf32> to vector<1x128xf32>
    %112 = vector.broadcast %109 : vector<1x128xf32> to vector<8x128xf32>
    %113 = arith.addf %96, %112 : vector<8x128xf32>
    %114 = vector.broadcast %110 : vector<1x128xf32> to vector<8x128xf32>
    %115 = arith.mulf %113, %114 : vector<8x128xf32>
    %c1_32 = arith.constant 1 : index
    %c0_33 = arith.constant 0 : index
    %c0_34 = arith.constant 0 : index
    %116 = vector.load %arg1[%c1_32, %c0_33, %c0_34] : memref<4x128x16xf32, #tpu.memory_space<vmem>>, vector<1x128x16xf32>
    %117 = vector.shape_cast %116 : vector<1x128x16xf32> to vector<128x16xf32>
    %cst_35 = arith.constant dense<0.000000e+00> : vector<8x16xf32>
    %118 = tpu.matmul %115, %117, %cst_35 {dimension_numbers = #tpu.dot_dimension_numbers<[1], [0], [0], [1], [0, 0, 1, 1], [], []>} : vector<8x128xf32>, vector<128x16xf32>, vector<8x16xf32> -> vector<8x16xf32>
    %119 = vector.broadcast %102 : vector<1x16xf32> to vector<8x16xf32>
    %120 = arith.addf %118, %119 : vector<8x16xf32>
    %cst_36 = arith.constant 0.000000e+00 : f32
    %121 = vector.broadcast %cst_36 : f32 to vector<8x16xf32>
    %122 = arith.cmpf oge, %120, %121 : vector<8x16xf32>
    %cst_37 = arith.constant 0.00999999977 : f32
    %123 = vector.broadcast %cst_37 : f32 to vector<8x16xf32>
    %124 = arith.mulf %123, %120 : vector<8x16xf32>
    %125 = arith.select %122, %120, %124 : vector<8x16xi1>, vector<8x16xf32>
    %cst_38 = arith.constant dense<0.000000e+00> : vector<16xf32>
    %126 = vector.multi_reduction <add>, %125, %cst_38 [0] : vector<8x16xf32> to vector<16xf32>
    %127 = vector.shape_cast %126 : vector<16xf32> to vector<1x16xf32>
    %cst_39 = arith.constant 8.000000e+00 : f32
    %128 = vector.broadcast %cst_39 : f32 to vector<1x16xf32>
    %129 = arith.divf %127, %128 : vector<1x16xf32>
    %130 = vector.broadcast %129 : vector<1x16xf32> to vector<8x16xf32>
    %131 = arith.subf %125, %130 : vector<8x16xf32>
    %132 = vector.broadcast %129 : vector<1x16xf32> to vector<8x16xf32>
    %133 = arith.subf %125, %132 : vector<8x16xf32>
    %134 = arith.mulf %131, %133 : vector<8x16xf32>
    %cst_40 = arith.constant dense<0.000000e+00> : vector<16xf32>
    %135 = vector.multi_reduction <add>, %134, %cst_40 [0] : vector<8x16xf32> to vector<16xf32>
    %136 = vector.shape_cast %135 : vector<16xf32> to vector<1x16xf32>
    %cst_41 = arith.constant 8.000000e+00 : f32
    %137 = vector.broadcast %cst_41 : f32 to vector<1x16xf32>
    %138 = arith.divf %136, %137 : vector<1x16xf32>
    %139 = vector.broadcast %129 : vector<1x16xf32> to vector<8x16xf32>
    %140 = arith.subf %125, %139 : vector<8x16xf32>
    %cst_42 = arith.constant 0.00999999977 : f32
    %141 = vector.broadcast %cst_42 : f32 to vector<1x16xf32>
    %142 = arith.addf %138, %141 : vector<1x16xf32>
    %143 = math.rsqrt %142 : vector<1x16xf32>
    %144 = vector.broadcast %143 : vector<1x16xf32> to vector<8x16xf32>
    %145 = arith.mulf %140, %144 : vector<8x16xf32>
    %146 = vector.broadcast %103 : vector<1x16xf32> to vector<8x16xf32>
    %147 = arith.mulf %145, %146 : vector<8x16xf32>
    %148 = vector.broadcast %104 : vector<1x16xf32> to vector<8x16xf32>
    %149 = arith.addf %147, %148 : vector<8x16xf32>
    %c1_43 = arith.constant 1 : index
    %c0_44 = arith.constant 0 : index
    %c0_45 = arith.constant 0 : index
    %150 = vector.load %arg2[%c1_43, %c0_44, %c0_45] : memref<4x16x16xf32, #tpu.memory_space<vmem>>, vector<1x16x16xf32>
    %151 = vector.shape_cast %150 : vector<1x16x16xf32> to vector<16x16xf32>
    %cst_46 = arith.constant dense<0.000000e+00> : vector<8x16xf32>
    %152 = tpu.matmul %149, %151, %cst_46 {dimension_numbers = #tpu.dot_dimension_numbers<[1], [0], [0], [1], [0, 0, 1, 1], [], []>} : vector<8x16xf32>, vector<16x16xf32>, vector<8x16xf32> -> vector<8x16xf32>
    %153 = vector.broadcast %105 : vector<1x16xf32> to vector<8x16xf32>
    %154 = arith.addf %152, %153 : vector<8x16xf32>
    %cst_47 = arith.constant 0.000000e+00 : f32
    %155 = vector.broadcast %cst_47 : f32 to vector<8x16xf32>
    %156 = arith.cmpf oge, %154, %155 : vector<8x16xf32>
    %cst_48 = arith.constant 0.00999999977 : f32
    %157 = vector.broadcast %cst_48 : f32 to vector<8x16xf32>
    %158 = arith.mulf %157, %154 : vector<8x16xf32>
    %159 = arith.select %156, %154, %158 : vector<8x16xi1>, vector<8x16xf32>
    %cst_49 = arith.constant dense<0.000000e+00> : vector<16xf32>
    %160 = vector.multi_reduction <add>, %159, %cst_49 [0] : vector<8x16xf32> to vector<16xf32>
    %161 = vector.shape_cast %160 : vector<16xf32> to vector<1x16xf32>
    %cst_50 = arith.constant 8.000000e+00 : f32
    %162 = vector.broadcast %cst_50 : f32 to vector<1x16xf32>
    %163 = arith.divf %161, %162 : vector<1x16xf32>
    %164 = vector.broadcast %163 : vector<1x16xf32> to vector<8x16xf32>
    %165 = arith.subf %159, %164 : vector<8x16xf32>
    %166 = vector.broadcast %163 : vector<1x16xf32> to vector<8x16xf32>
    %167 = arith.subf %159, %166 : vector<8x16xf32>
    %168 = arith.mulf %165, %167 : vector<8x16xf32>
    %cst_51 = arith.constant dense<0.000000e+00> : vector<16xf32>
    %169 = vector.multi_reduction <add>, %168, %cst_51 [0] : vector<8x16xf32> to vector<16xf32>
    %170 = vector.shape_cast %169 : vector<16xf32> to vector<1x16xf32>
    %cst_52 = arith.constant 8.000000e+00 : f32
    %171 = vector.broadcast %cst_52 : f32 to vector<1x16xf32>
    %172 = arith.divf %170, %171 : vector<1x16xf32>
    %173 = vector.broadcast %163 : vector<1x16xf32> to vector<8x16xf32>
    %174 = arith.subf %159, %173 : vector<8x16xf32>
    %cst_53 = arith.constant 0.00999999977 : f32
    %175 = vector.broadcast %cst_53 : f32 to vector<1x16xf32>
    %176 = arith.addf %172, %175 : vector<1x16xf32>
    %177 = math.rsqrt %176 : vector<1x16xf32>
    %178 = vector.broadcast %177 : vector<1x16xf32> to vector<8x16xf32>
    %179 = arith.mulf %174, %178 : vector<8x16xf32>
    %180 = vector.broadcast %106 : vector<1x16xf32> to vector<8x16xf32>
    %181 = arith.mulf %179, %180 : vector<8x16xf32>
    %182 = vector.broadcast %107 : vector<1x16xf32> to vector<8x16xf32>
    %183 = arith.addf %181, %182 : vector<8x16xf32>
    %c1_54 = arith.constant 1 : index
    %c0_55 = arith.constant 0 : index
    %c0_56 = arith.constant 0 : index
    %184 = vector.load %arg3[%c1_54, %c0_55, %c0_56] : memref<4x16x256xf32, #tpu.memory_space<vmem>>, vector<1x16x256xf32>
    %185 = vector.shape_cast %184 : vector<1x16x256xf32> to vector<16x256xf32>
    %cst_57 = arith.constant dense<0.000000e+00> : vector<8x256xf32>
    %186 = tpu.matmul %183, %185, %cst_57 {dimension_numbers = #tpu.dot_dimension_numbers<[1], [0], [0], [1], [0, 0, 1, 1], [], []>} : vector<8x16xf32>, vector<16x256xf32>, vector<8x256xf32> -> vector<8x256xf32>
    %187 = vector.broadcast %108 : vector<1x256xf32> to vector<8x256xf32>
    %188 = arith.addf %186, %187 : vector<8x256xf32>
    %189 = vector.extract_strided_slice %188 {offsets = [0, 0], sizes = [8, 128], strides = [1, 1]} : vector<8x256xf32> to vector<8x128xf32>
    %190 = math.tanh %189 : vector<8x128xf32>
    %191 = vector.extract_strided_slice %188 {offsets = [0, 128], sizes = [8, 128], strides = [1, 1]} : vector<8x256xf32> to vector<8x128xf32>
    %192 = arith.addf %115, %191 : vector<8x128xf32>
    %193 = math.exp %190 : vector<8x128xf32>
    %194 = arith.mulf %192, %193 : vector<8x128xf32>
    %195 = arith.addf %99, %190 : vector<8x128xf32>
    %196 = vector.broadcast %111 : vector<1x128xf32> to vector<8x128xf32>
    %197 = arith.addf %195, %196 : vector<8x128xf32>
    %c2 = arith.constant 2 : index
    %c0_58 = arith.constant 0 : index
    %c0_59 = arith.constant 0 : index
    %198 = vector.load %arg4[%c2, %c0_58, %c0_59] : memref<4x16x256xf32, #tpu.memory_space<vmem>>, vector<1x16x256xf32>
    %199 = vector.shape_cast %198 : vector<1x16x256xf32> to vector<16x256xf32>
    %200 = vector.extract_strided_slice %199 {offsets = [0, 0], sizes = [1, 16], strides = [1, 1]} : vector<16x256xf32> to vector<1x16xf32>
    %201 = vector.extract_strided_slice %199 {offsets = [1, 0], sizes = [1, 16], strides = [1, 1]} : vector<16x256xf32> to vector<1x16xf32>
    %202 = vector.extract_strided_slice %199 {offsets = [2, 0], sizes = [1, 16], strides = [1, 1]} : vector<16x256xf32> to vector<1x16xf32>
    %203 = vector.extract_strided_slice %199 {offsets = [3, 0], sizes = [1, 16], strides = [1, 1]} : vector<16x256xf32> to vector<1x16xf32>
    %204 = vector.extract_strided_slice %199 {offsets = [4, 0], sizes = [1, 16], strides = [1, 1]} : vector<16x256xf32> to vector<1x16xf32>
    %205 = vector.extract_strided_slice %199 {offsets = [5, 0], sizes = [1, 16], strides = [1, 1]} : vector<16x256xf32> to vector<1x16xf32>
    %206 = vector.extract_strided_slice %199 {offsets = [6, 0], sizes = [1, 256], strides = [1, 1]} : vector<16x256xf32> to vector<1x256xf32>
    %207 = vector.extract_strided_slice %199 {offsets = [7, 0], sizes = [1, 128], strides = [1, 1]} : vector<16x256xf32> to vector<1x128xf32>
    %208 = vector.extract_strided_slice %199 {offsets = [8, 0], sizes = [1, 128], strides = [1, 1]} : vector<16x256xf32> to vector<1x128xf32>
    %209 = vector.extract_strided_slice %199 {offsets = [9, 0], sizes = [1, 128], strides = [1, 1]} : vector<16x256xf32> to vector<1x128xf32>
    %210 = vector.broadcast %207 : vector<1x128xf32> to vector<8x128xf32>
    %211 = arith.addf %194, %210 : vector<8x128xf32>
    %212 = vector.broadcast %208 : vector<1x128xf32> to vector<8x128xf32>
    %213 = arith.mulf %211, %212 : vector<8x128xf32>
    %c2_60 = arith.constant 2 : index
    %c0_61 = arith.constant 0 : index
    %c0_62 = arith.constant 0 : index
    %214 = vector.load %arg1[%c2_60, %c0_61, %c0_62] : memref<4x128x16xf32, #tpu.memory_space<vmem>>, vector<1x128x16xf32>
    %215 = vector.shape_cast %214 : vector<1x128x16xf32> to vector<128x16xf32>
    %cst_63 = arith.constant dense<0.000000e+00> : vector<8x16xf32>
    %216 = tpu.matmul %213, %215, %cst_63 {dimension_numbers = #tpu.dot_dimension_numbers<[1], [0], [0], [1], [0, 0, 1, 1], [], []>} : vector<8x128xf32>, vector<128x16xf32>, vector<8x16xf32> -> vector<8x16xf32>
    %217 = vector.broadcast %200 : vector<1x16xf32> to vector<8x16xf32>
    %218 = arith.addf %216, %217 : vector<8x16xf32>
    %cst_64 = arith.constant 0.000000e+00 : f32
    %219 = vector.broadcast %cst_64 : f32 to vector<8x16xf32>
    %220 = arith.cmpf oge, %218, %219 : vector<8x16xf32>
    %cst_65 = arith.constant 0.00999999977 : f32
    %221 = vector.broadcast %cst_65 : f32 to vector<8x16xf32>
    %222 = arith.mulf %221, %218 : vector<8x16xf32>
    %223 = arith.select %220, %218, %222 : vector<8x16xi1>, vector<8x16xf32>
    %cst_66 = arith.constant dense<0.000000e+00> : vector<16xf32>
    %224 = vector.multi_reduction <add>, %223, %cst_66 [0] : vector<8x16xf32> to vector<16xf32>
    %225 = vector.shape_cast %224 : vector<16xf32> to vector<1x16xf32>
    %cst_67 = arith.constant 8.000000e+00 : f32
    %226 = vector.broadcast %cst_67 : f32 to vector<1x16xf32>
    %227 = arith.divf %225, %226 : vector<1x16xf32>
    %228 = vector.broadcast %227 : vector<1x16xf32> to vector<8x16xf32>
    %229 = arith.subf %223, %228 : vector<8x16xf32>
    %230 = vector.broadcast %227 : vector<1x16xf32> to vector<8x16xf32>
    %231 = arith.subf %223, %230 : vector<8x16xf32>
    %232 = arith.mulf %229, %231 : vector<8x16xf32>
    %cst_68 = arith.constant dense<0.000000e+00> : vector<16xf32>
    %233 = vector.multi_reduction <add>, %232, %cst_68 [0] : vector<8x16xf32> to vector<16xf32>
    %234 = vector.shape_cast %233 : vector<16xf32> to vector<1x16xf32>
    %cst_69 = arith.constant 8.000000e+00 : f32
    %235 = vector.broadcast %cst_69 : f32 to vector<1x16xf32>
    %236 = arith.divf %234, %235 : vector<1x16xf32>
    %237 = vector.broadcast %227 : vector<1x16xf32> to vector<8x16xf32>
    %238 = arith.subf %223, %237 : vector<8x16xf32>
    %cst_70 = arith.constant 0.00999999977 : f32
    %239 = vector.broadcast %cst_70 : f32 to vector<1x16xf32>
    %240 = arith.addf %236, %239 : vector<1x16xf32>
    %241 = math.rsqrt %240 : vector<1x16xf32>
    %242 = vector.broadcast %241 : vector<1x16xf32> to vector<8x16xf32>
    %243 = arith.mulf %238, %242 : vector<8x16xf32>
    %244 = vector.broadcast %201 : vector<1x16xf32> to vector<8x16xf32>
    %245 = arith.mulf %243, %244 : vector<8x16xf32>
    %246 = vector.broadcast %202 : vector<1x16xf32> to vector<8x16xf32>
    %247 = arith.addf %245, %246 : vector<8x16xf32>
    %c2_71 = arith.constant 2 : index
    %c0_72 = arith.constant 0 : index
    %c0_73 = arith.constant 0 : index
    %248 = vector.load %arg2[%c2_71, %c0_72, %c0_73] : memref<4x16x16xf32, #tpu.memory_space<vmem>>, vector<1x16x16xf32>
    %249 = vector.shape_cast %248 : vector<1x16x16xf32> to vector<16x16xf32>
    %cst_74 = arith.constant dense<0.000000e+00> : vector<8x16xf32>
    %250 = tpu.matmul %247, %249, %cst_74 {dimension_numbers = #tpu.dot_dimension_numbers<[1], [0], [0], [1], [0, 0, 1, 1], [], []>} : vector<8x16xf32>, vector<16x16xf32>, vector<8x16xf32> -> vector<8x16xf32>
    %251 = vector.broadcast %203 : vector<1x16xf32> to vector<8x16xf32>
    %252 = arith.addf %250, %251 : vector<8x16xf32>
    %cst_75 = arith.constant 0.000000e+00 : f32
    %253 = vector.broadcast %cst_75 : f32 to vector<8x16xf32>
    %254 = arith.cmpf oge, %252, %253 : vector<8x16xf32>
    %cst_76 = arith.constant 0.00999999977 : f32
    %255 = vector.broadcast %cst_76 : f32 to vector<8x16xf32>
    %256 = arith.mulf %255, %252 : vector<8x16xf32>
    %257 = arith.select %254, %252, %256 : vector<8x16xi1>, vector<8x16xf32>
    %cst_77 = arith.constant dense<0.000000e+00> : vector<16xf32>
    %258 = vector.multi_reduction <add>, %257, %cst_77 [0] : vector<8x16xf32> to vector<16xf32>
    %259 = vector.shape_cast %258 : vector<16xf32> to vector<1x16xf32>
    %cst_78 = arith.constant 8.000000e+00 : f32
    %260 = vector.broadcast %cst_78 : f32 to vector<1x16xf32>
    %261 = arith.divf %259, %260 : vector<1x16xf32>
    %262 = vector.broadcast %261 : vector<1x16xf32> to vector<8x16xf32>
    %263 = arith.subf %257, %262 : vector<8x16xf32>
    %264 = vector.broadcast %261 : vector<1x16xf32> to vector<8x16xf32>
    %265 = arith.subf %257, %264 : vector<8x16xf32>
    %266 = arith.mulf %263, %265 : vector<8x16xf32>
    %cst_79 = arith.constant dense<0.000000e+00> : vector<16xf32>
    %267 = vector.multi_reduction <add>, %266, %cst_79 [0] : vector<8x16xf32> to vector<16xf32>
    %268 = vector.shape_cast %267 : vector<16xf32> to vector<1x16xf32>
    %cst_80 = arith.constant 8.000000e+00 : f32
    %269 = vector.broadcast %cst_80 : f32 to vector<1x16xf32>
    %270 = arith.divf %268, %269 : vector<1x16xf32>
    %271 = vector.broadcast %261 : vector<1x16xf32> to vector<8x16xf32>
    %272 = arith.subf %257, %271 : vector<8x16xf32>
    %cst_81 = arith.constant 0.00999999977 : f32
    %273 = vector.broadcast %cst_81 : f32 to vector<1x16xf32>
    %274 = arith.addf %270, %273 : vector<1x16xf32>
    %275 = math.rsqrt %274 : vector<1x16xf32>
    %276 = vector.broadcast %275 : vector<1x16xf32> to vector<8x16xf32>
    %277 = arith.mulf %272, %276 : vector<8x16xf32>
    %278 = vector.broadcast %204 : vector<1x16xf32> to vector<8x16xf32>
    %279 = arith.mulf %277, %278 : vector<8x16xf32>
    %280 = vector.broadcast %205 : vector<1x16xf32> to vector<8x16xf32>
    %281 = arith.addf %279, %280 : vector<8x16xf32>
    %c2_82 = arith.constant 2 : index
    %c0_83 = arith.constant 0 : index
    %c0_84 = arith.constant 0 : index
    %282 = vector.load %arg3[%c2_82, %c0_83, %c0_84] : memref<4x16x256xf32, #tpu.memory_space<vmem>>, vector<1x16x256xf32>
    %283 = vector.shape_cast %282 : vector<1x16x256xf32> to vector<16x256xf32>
    %cst_85 = arith.constant dense<0.000000e+00> : vector<8x256xf32>
    %284 = tpu.matmul %281, %283, %cst_85 {dimension_numbers = #tpu.dot_dimension_numbers<[1], [0], [0], [1], [0, 0, 1, 1], [], []>} : vector<8x16xf32>, vector<16x256xf32>, vector<8x256xf32> -> vector<8x256xf32>
    %285 = vector.broadcast %206 : vector<1x256xf32> to vector<8x256xf32>
    %286 = arith.addf %284, %285 : vector<8x256xf32>
    %287 = vector.extract_strided_slice %286 {offsets = [0, 0], sizes = [8, 128], strides = [1, 1]} : vector<8x256xf32> to vector<8x128xf32>
    %288 = math.tanh %287 : vector<8x128xf32>
    %289 = vector.extract_strided_slice %286 {offsets = [0, 128], sizes = [8, 128], strides = [1, 1]} : vector<8x256xf32> to vector<8x128xf32>
    %290 = arith.addf %213, %289 : vector<8x128xf32>
    %291 = math.exp %288 : vector<8x128xf32>
    %292 = arith.mulf %290, %291 : vector<8x128xf32>
    %293 = arith.addf %197, %288 : vector<8x128xf32>
    %294 = vector.broadcast %209 : vector<1x128xf32> to vector<8x128xf32>
    %295 = arith.addf %293, %294 : vector<8x128xf32>
    %c3 = arith.constant 3 : index
    %c0_86 = arith.constant 0 : index
    %c0_87 = arith.constant 0 : index
    %296 = vector.load %arg4[%c3, %c0_86, %c0_87] : memref<4x16x256xf32, #tpu.memory_space<vmem>>, vector<1x16x256xf32>
    %297 = vector.shape_cast %296 : vector<1x16x256xf32> to vector<16x256xf32>
    %298 = vector.extract_strided_slice %297 {offsets = [0, 0], sizes = [1, 16], strides = [1, 1]} : vector<16x256xf32> to vector<1x16xf32>
    %299 = vector.extract_strided_slice %297 {offsets = [1, 0], sizes = [1, 16], strides = [1, 1]} : vector<16x256xf32> to vector<1x16xf32>
    %300 = vector.extract_strided_slice %297 {offsets = [2, 0], sizes = [1, 16], strides = [1, 1]} : vector<16x256xf32> to vector<1x16xf32>
    %301 = vector.extract_strided_slice %297 {offsets = [3, 0], sizes = [1, 16], strides = [1, 1]} : vector<16x256xf32> to vector<1x16xf32>
    %302 = vector.extract_strided_slice %297 {offsets = [4, 0], sizes = [1, 16], strides = [1, 1]} : vector<16x256xf32> to vector<1x16xf32>
    %303 = vector.extract_strided_slice %297 {offsets = [5, 0], sizes = [1, 16], strides = [1, 1]} : vector<16x256xf32> to vector<1x16xf32>
    %304 = vector.extract_strided_slice %297 {offsets = [6, 0], sizes = [1, 256], strides = [1, 1]} : vector<16x256xf32> to vector<1x256xf32>
    %305 = vector.extract_strided_slice %297 {offsets = [7, 0], sizes = [1, 128], strides = [1, 1]} : vector<16x256xf32> to vector<1x128xf32>
    %306 = vector.extract_strided_slice %297 {offsets = [8, 0], sizes = [1, 128], strides = [1, 1]} : vector<16x256xf32> to vector<1x128xf32>
    %307 = vector.extract_strided_slice %297 {offsets = [9, 0], sizes = [1, 128], strides = [1, 1]} : vector<16x256xf32> to vector<1x128xf32>
    %308 = vector.broadcast %305 : vector<1x128xf32> to vector<8x128xf32>
    %309 = arith.addf %292, %308 : vector<8x128xf32>
    %310 = vector.broadcast %306 : vector<1x128xf32> to vector<8x128xf32>
    %311 = arith.mulf %309, %310 : vector<8x128xf32>
    %c3_88 = arith.constant 3 : index
    %c0_89 = arith.constant 0 : index
    %c0_90 = arith.constant 0 : index
    %312 = vector.load %arg1[%c3_88, %c0_89, %c0_90] : memref<4x128x16xf32, #tpu.memory_space<vmem>>, vector<1x128x16xf32>
    %313 = vector.shape_cast %312 : vector<1x128x16xf32> to vector<128x16xf32>
    %cst_91 = arith.constant dense<0.000000e+00> : vector<8x16xf32>
    %314 = tpu.matmul %311, %313, %cst_91 {dimension_numbers = #tpu.dot_dimension_numbers<[1], [0], [0], [1], [0, 0, 1, 1], [], []>} : vector<8x128xf32>, vector<128x16xf32>, vector<8x16xf32> -> vector<8x16xf32>
    %315 = vector.broadcast %298 : vector<1x16xf32> to vector<8x16xf32>
    %316 = arith.addf %314, %315 : vector<8x16xf32>
    %cst_92 = arith.constant 0.000000e+00 : f32
    %317 = vector.broadcast %cst_92 : f32 to vector<8x16xf32>
    %318 = arith.cmpf oge, %316, %317 : vector<8x16xf32>
    %cst_93 = arith.constant 0.00999999977 : f32
    %319 = vector.broadcast %cst_93 : f32 to vector<8x16xf32>
    %320 = arith.mulf %319, %316 : vector<8x16xf32>
    %321 = arith.select %318, %316, %320 : vector<8x16xi1>, vector<8x16xf32>
    %cst_94 = arith.constant dense<0.000000e+00> : vector<16xf32>
    %322 = vector.multi_reduction <add>, %321, %cst_94 [0] : vector<8x16xf32> to vector<16xf32>
    %323 = vector.shape_cast %322 : vector<16xf32> to vector<1x16xf32>
    %cst_95 = arith.constant 8.000000e+00 : f32
    %324 = vector.broadcast %cst_95 : f32 to vector<1x16xf32>
    %325 = arith.divf %323, %324 : vector<1x16xf32>
    %326 = vector.broadcast %325 : vector<1x16xf32> to vector<8x16xf32>
    %327 = arith.subf %321, %326 : vector<8x16xf32>
    %328 = vector.broadcast %325 : vector<1x16xf32> to vector<8x16xf32>
    %329 = arith.subf %321, %328 : vector<8x16xf32>
    %330 = arith.mulf %327, %329 : vector<8x16xf32>
    %cst_96 = arith.constant dense<0.000000e+00> : vector<16xf32>
    %331 = vector.multi_reduction <add>, %330, %cst_96 [0] : vector<8x16xf32> to vector<16xf32>
    %332 = vector.shape_cast %331 : vector<16xf32> to vector<1x16xf32>
    %cst_97 = arith.constant 8.000000e+00 : f32
    %333 = vector.broadcast %cst_97 : f32 to vector<1x16xf32>
    %334 = arith.divf %332, %333 : vector<1x16xf32>
    %335 = vector.broadcast %325 : vector<1x16xf32> to vector<8x16xf32>
    %336 = arith.subf %321, %335 : vector<8x16xf32>
    %cst_98 = arith.constant 0.00999999977 : f32
    %337 = vector.broadcast %cst_98 : f32 to vector<1x16xf32>
    %338 = arith.addf %334, %337 : vector<1x16xf32>
    %339 = math.rsqrt %338 : vector<1x16xf32>
    %340 = vector.broadcast %339 : vector<1x16xf32> to vector<8x16xf32>
    %341 = arith.mulf %336, %340 : vector<8x16xf32>
    %342 = vector.broadcast %299 : vector<1x16xf32> to vector<8x16xf32>
    %343 = arith.mulf %341, %342 : vector<8x16xf32>
    %344 = vector.broadcast %300 : vector<1x16xf32> to vector<8x16xf32>
    %345 = arith.addf %343, %344 : vector<8x16xf32>
    %c3_99 = arith.constant 3 : index
    %c0_100 = arith.constant 0 : index
    %c0_101 = arith.constant 0 : index
    %346 = vector.load %arg2[%c3_99, %c0_100, %c0_101] : memref<4x16x16xf32, #tpu.memory_space<vmem>>, vector<1x16x16xf32>
    %347 = vector.shape_cast %346 : vector<1x16x16xf32> to vector<16x16xf32>
    %cst_102 = arith.constant dense<0.000000e+00> : vector<8x16xf32>
    %348 = tpu.matmul %345, %347, %cst_102 {dimension_numbers = #tpu.dot_dimension_numbers<[1], [0], [0], [1], [0, 0, 1, 1], [], []>} : vector<8x16xf32>, vector<16x16xf32>, vector<8x16xf32> -> vector<8x16xf32>
    %349 = vector.broadcast %301 : vector<1x16xf32> to vector<8x16xf32>
    %350 = arith.addf %348, %349 : vector<8x16xf32>
    %cst_103 = arith.constant 0.000000e+00 : f32
    %351 = vector.broadcast %cst_103 : f32 to vector<8x16xf32>
    %352 = arith.cmpf oge, %350, %351 : vector<8x16xf32>
    %cst_104 = arith.constant 0.00999999977 : f32
    %353 = vector.broadcast %cst_104 : f32 to vector<8x16xf32>
    %354 = arith.mulf %353, %350 : vector<8x16xf32>
    %355 = arith.select %352, %350, %354 : vector<8x16xi1>, vector<8x16xf32>
    %cst_105 = arith.constant dense<0.000000e+00> : vector<16xf32>
    %356 = vector.multi_reduction <add>, %355, %cst_105 [0] : vector<8x16xf32> to vector<16xf32>
    %357 = vector.shape_cast %356 : vector<16xf32> to vector<1x16xf32>
    %cst_106 = arith.constant 8.000000e+00 : f32
    %358 = vector.broadcast %cst_106 : f32 to vector<1x16xf32>
    %359 = arith.divf %357, %358 : vector<1x16xf32>
    %360 = vector.broadcast %359 : vector<1x16xf32> to vector<8x16xf32>
    %361 = arith.subf %355, %360 : vector<8x16xf32>
    %362 = vector.broadcast %359 : vector<1x16xf32> to vector<8x16xf32>
    %363 = arith.subf %355, %362 : vector<8x16xf32>
    %364 = arith.mulf %361, %363 : vector<8x16xf32>
    %cst_107 = arith.constant dense<0.000000e+00> : vector<16xf32>
    %365 = vector.multi_reduction <add>, %364, %cst_107 [0] : vector<8x16xf32> to vector<16xf32>
    %366 = vector.shape_cast %365 : vector<16xf32> to vector<1x16xf32>
    %cst_108 = arith.constant 8.000000e+00 : f32
    %367 = vector.broadcast %cst_108 : f32 to vector<1x16xf32>
    %368 = arith.divf %366, %367 : vector<1x16xf32>
    %369 = vector.broadcast %359 : vector<1x16xf32> to vector<8x16xf32>
    %370 = arith.subf %355, %369 : vector<8x16xf32>
    %cst_109 = arith.constant 0.00999999977 : f32
    %371 = vector.broadcast %cst_109 : f32 to vector<1x16xf32>
    %372 = arith.addf %368, %371 : vector<1x16xf32>
    %373 = math.rsqrt %372 : vector<1x16xf32>
    %374 = vector.broadcast %373 : vector<1x16xf32> to vector<8x16xf32>
    %375 = arith.mulf %370, %374 : vector<8x16xf32>
    %376 = vector.broadcast %302 : vector<1x16xf32> to vector<8x16xf32>
    %377 = arith.mulf %375, %376 : vector<8x16xf32>
    %378 = vector.broadcast %303 : vector<1x16xf32> to vector<8x16xf32>
    %379 = arith.addf %377, %378 : vector<8x16xf32>
    %c3_110 = arith.constant 3 : index
    %c0_111 = arith.constant 0 : index
    %c0_112 = arith.constant 0 : index
    %380 = vector.load %arg3[%c3_110, %c0_111, %c0_112] : memref<4x16x256xf32, #tpu.memory_space<vmem>>, vector<1x16x256xf32>
    %381 = vector.shape_cast %380 : vector<1x16x256xf32> to vector<16x256xf32>
    %cst_113 = arith.constant dense<0.000000e+00> : vector<8x256xf32>
    %382 = tpu.matmul %379, %381, %cst_113 {dimension_numbers = #tpu.dot_dimension_numbers<[1], [0], [0], [1], [0, 0, 1, 1], [], []>} : vector<8x16xf32>, vector<16x256xf32>, vector<8x256xf32> -> vector<8x256xf32>
    %383 = vector.broadcast %304 : vector<1x256xf32> to vector<8x256xf32>
    %384 = arith.addf %382, %383 : vector<8x256xf32>
    %385 = vector.extract_strided_slice %384 {offsets = [0, 0], sizes = [8, 128], strides = [1, 1]} : vector<8x256xf32> to vector<8x128xf32>
    %386 = math.tanh %385 : vector<8x128xf32>
    %387 = vector.extract_strided_slice %384 {offsets = [0, 128], sizes = [8, 128], strides = [1, 1]} : vector<8x256xf32> to vector<8x128xf32>
    %388 = arith.addf %311, %387 : vector<8x128xf32>
    %389 = math.exp %386 : vector<8x128xf32>
    %390 = arith.mulf %388, %389 : vector<8x128xf32>
    %391 = arith.addf %295, %386 : vector<8x128xf32>
    %392 = vector.broadcast %307 : vector<1x128xf32> to vector<8x128xf32>
    %393 = arith.addf %391, %392 : vector<8x128xf32>
    %c0_114 = arith.constant 0 : index
    %c0_115 = arith.constant 0 : index
    %394 = vector.load %arg5[%c0_114, %c0_115] : memref<8x128xf32, #tpu.memory_space<vmem>>, vector<8x128xf32>
    tpu.vector_store %arg5[%c0_114, %c0_115], %390 {strides = array<i32>} : memref<8x128xf32, #tpu.memory_space<vmem>>, vector<8x128xf32>,
    %cst_116 = arith.constant dense<0.000000e+00> : vector<8xf32>
    %395 = vector.multi_reduction <add>, %393, %cst_116 [1] : vector<8x128xf32> to vector<8xf32>
    %396 = vector.shape_cast %395 : vector<8xf32> to vector<8x1xf32>
    %c0_117 = arith.constant 0 : index
    %c0_118 = arith.constant 0 : index
    %397 = vector.load %arg6[%c0_117, %c0_118] : memref<8x1xf32, #tpu.memory_space<vmem>>, vector<8x1xf32>
    tpu.vector_store %arg6[%c0_117, %c0_118], %396 {strides = array<i32>} : memref<8x1xf32, #tpu.memory_space<vmem>>, vector<8x1xf32>,
    return
  }
}

</mosaic_0001>

<bundles_post_ra>
// kernel: _realnvp_forward_fused.1
= control target key start
LH: loop header
LB: loop body
LE: loop exit
PB: predicated region body
PF: predicated region fallthrough
CT: control target
= control target key end

     0   :  { %v1928_v0 = vmov 0.0|0.0   ;;  %vm1929_vm0 = vmmov 0   ;;  %v1930_v4 = vmov 0.0   ;;  %v26_v13 = vlaneseq  ;;  %s2506_s1 = inlined_call_operand.vmem [shape: f32[4,128,16], index: 1, kind: input, shape index: {}]   ;;  %s2507_s4 = inlined_call_operand.vmem [shape: f32[4,16,256], index: 4, kind: input, shape index: {}]   ;;  %s2508_s0 = inlined_call_operand.vmem [shape: f32[8,128], index: 0, kind: input, shape index: {}]   ;;  %s2509_s2 = inlined_call_operand.vmem [shape: f32[4,16,16], index: 2, kind: input, shape index: {}]   ;;  %s2510_s3 = inlined_call_operand.vmem [shape: f32[4,16,256], index: 3, kind: input, shape index: {}]   ;;  %s2511_s5 = inlined_call_operand.vmem [shape: f32[8,128], index: 5, kind: output, shape index: {0}]   ;;  %s2512_s6 = inlined_call_operand.vmem [shape: f32[8,1], index: 6, kind: output, shape index: {1}]  }
   0x1   :  { %1769 = vmatprep.subr.bf16.mxu0 %v1928_v0  ;;  %v36_v1 = vld [vmem:[%s2506_s1] sm:$0xff]  ;;  %v37_v2 = vld [vmem:[%s2506_s1 + $0x8] sm:$0xff]  ;;  %v38_v3 = vld [vmem:[%s2506_s1 + $0x10] sm:$0xff]  ;;  %1633 = vmatprep.mubr.msk.f32.mxu0 %vm1929_vm0, %v1930_v4  ;;  %vm129_vm2 = vcmask 130048   ;;  %vm1428_vm10 = vcmask 7168  }
   0x2   :  { %v1770_v5 = vpack.c.bf16 %v37_v2, %v36_v1  ;;  %v39_v6 = vld [vmem:[%s2506_s1 + $0x18] sm:$0xff]  ;;  %1793 = vmatprep.subr.bf16.mxu1 %v1928_v0  ;;  %1640 = vmatprep.mubr.msk.f32.mxu1 %vm1929_vm0, %v1930_v4  ;;  %v40_v8 = vld [vmem:[%s2506_s1 + $0x20] sm:$0xff]  ;;  %v41_v9 = vld [vmem:[%s2506_s1 + $0x28] sm:$0xff]  ;;  %v2005_v17 = vshrl.u32 %v26_v13, 7 }
   0x3   :  { %v1773_v7 = vpack.c.bf16 %v39_v6, %v38_v3  ;;  %v1776_v10 = vpack.c.bf16 %v41_v9, %v40_v8  ;;  %v42_v11 = vld [vmem:[%s2506_s1 + $0x30] sm:$0xff]  ;;  %v43_v12 = vld [vmem:[%s2506_s1 + $0x38] sm:$0xff]  ;;  %v44_v15 = vld [vmem:[%s2506_s1 + $0x40] sm:$0xff] }
   0x4   :  { %1771 = vmatpush3.bf16.msra.mxu0 %v1770_v5  ;;  %v1779_v14 = vpack.c.bf16 %v43_v12, %v42_v11  ;;  %v45_v16 = vld [vmem:[%s2506_s1 + $0x48] sm:$0xff]  ;;  %v46_v19 = vld [vmem:[%s2506_s1 + $0x50] sm:$0xff]  ;;  %v47_v20 = vld [vmem:[%s2506_s1 + $0x58] sm:$0xff]  ;;  %v2015_v21 = vsub.s32 7, %v2005_v17  ;;  %v2032_v27 = vsub.s32 0, %v2005_v17  ;;  %v2069_v2 = vsub.s32 1, %v2005_v17 }
   0x5   :  { %1772 = vmatprep.subr.bf16.mxu0 %v1928_v0  ;;  %v1782_v18 = vpack.c.bf16 %v45_v16, %v44_v15  ;;  %v1785_v22 = vpack.c.bf16 %v47_v20, %v46_v19  ;;  %v2020_v23 = vld [vmem:[%s2507_s4] sm:$0xff]  ;;  %v49_v25 = vld [vmem:[%s2506_s1 + $0x68] sm:$0xff]  ;;  %v2040_v30 = vld [vmem:[%s2507_s4 + $0x10] sm:$0xff]  ;;  %v2072_v3 = vsub.s32 2, %v2005_v17 }
   0x6   :  { %v48_v24 = vld [vmem:[%s2506_s1 + $0x60] sm:$0xff]  ;;  %v29_v26 = vrot.slane %v2020_v23, %v2015_v21  ;;  %v50_v31 = vld [vmem:[%s2506_s1 + $0x70] sm:$0xff]  ;;  %v51_v32 = vld [vmem:[%s2506_s1 + $0x78] sm:$0xff]  ;;  %v34_v34 = vrot.slane %v2040_v30, %v2032_v27  ;;  %v55_v40 = vrot.slane %v2020_v23, %v2032_v27  ;;  %v155_v5 = vrot.slane %v2020_v23, %v2069_v2 }
   0x7   :  { %v1788_v28 = vpack.c.bf16 %v49_v25, %v48_v24  ;;  %v22_v29 = vld [vmem:[%s2508_s0] sm:$0xff]  ;;  %v1791_v35 = vpack.c.bf16 %v51_v32, %v50_v31  ;;  %v163_v38 = vld [vmem:[%s2509_s2 + $0x8] sm:$0xff]  ;;  %v160_v8 = vrot.slane %v2020_v23, %v2072_v3  ;;  %v278_v12 = vld [vmem:[%s2510_s3 + $0x18] sm:$0xff] }
   0x8   :  { %1774 = vmatpush3.bf16.msra.mxu0 %v1773_v7  ;;  %v30_v33 = vadd.f32 %v29_v26, %v22_v29  ;;  %v162_v37 = vld [vmem:[%s2509_s2] sm:$0xff]  ;;  %v276_v11 = vld [vmem:[%s2510_s3 + $0x8] sm:$0xff]  ;;  %v277_v15 = vld [vmem:[%s2510_s3 + $0x10] sm:$0xff] }
   0x9   :  { %1775 = vmatprep.subr.bf16.mxu0 %v1928_v0  ;;  %v1794_v39 = vpack.c.bf16 %v163_v38, %v162_v37  ;;  %v1796_v13 = vpack.c.bf16 %v278_v12, %v276_v11  ;;  %v1453_v12 = vld [vmem:[%s2506_s1 + $0xd0] sm:$0xff] }
   0xa   :  { %v2052_v36 = vmul.f32 %v34_v34, %v30_v33 }
   0xb   :  { %1795 = vmatpush3.bf16.msra.mxu1 %v1794_v39 }
   0xc   :  { %1777 = vmatpush3.bf16.msra.mxu0 %v1776_v10  ;;  %1797 = vmatprep.subr.bf16.mxu1 %v1796_v13  ;;  %v1454_v13 = vld [vmem:[%s2506_s1 + $0xd8] sm:$0xff] }
   0xd   :  { %1778 = vmatprep.subr.bf16.mxu0 %v1928_v0 }
  0x10   :  { %1780 = vmatpush3.bf16.msra.mxu0 %v1779_v14  ;;  %v275_v14 = vld [vmem:[%s2510_s3] sm:$0xff] }
  0x11   :  { %1781 = vmatprep.subr.bf16.mxu0 %v1928_v0  ;;  %v1798_v16 = vpack.c.bf16 %v277_v15, %v275_v14  ;;  %v1816_v14 = vpack.c.bf16 %v1454_v13, %v1453_v12  ;;  %v1455_v15 = vld [vmem:[%s2506_s1 + $0xe0] sm:$0xff] }
  0x14   :  { %1783 = vmatpush3.bf16.msra.mxu0 %v1782_v18  ;;  %v2094_v18 = vsub.s32 3, %v2005_v17 }
  0x15   :  { %1784 = vmatprep.subr.bf16.mxu0 %v1928_v0 }
  0x16   :  { %v167_v19 = vrot.slane %v2020_v23, %v2094_v18 }
  0x18   :  { %1786 = vmatpush3.bf16.msra.mxu0 %v1785_v22 }
  0x19   :  { %1787 = vmatprep.subr.bf16.mxu0 %v1928_v0 }
  0x1c   :  { %1789 = vmatpush3.bf16.msra.mxu0 %v1788_v28 }
  0x1d   :  { %1790 = vmatprep.subr.bf16.mxu0 %v1928_v0 }
  0x20   :  { %1792 = vmatpush3.bf16.msra.mxu0 %v1791_v35 }
  0x21   :  { %1824 = vmatprep.subr.bf16.mxu0 %v1928_v0 }
  0x23   :  { %1634 = vmatmul.mubr.f32.vlgmr.msra.gmra.mrb[0].mxu0 %v2052_v36 }
  0x24   :  { %1682 = vmatprep.mubr.msk.f32.mxu0 %vm1929_vm0, %v1930_v4 }
  0xf6   :  { %v122_v41 = vpop.f32.mrb[0].mxu0 }
  0xf7   :  { %v123_v42 = vadd.f32 %v122_v41, %v55_v40  ;;  %v1635_v43 = vpop.f32.mrb[1].mxu0 }
  0xf9   :  { %vm126_vm1 = vcmp.ge.f32.partialorder %v123_v42, 0.0  ;;  %v127_v44 = vmul.f32 0.01, %v123_v42 }
  0xfb   :  { %v128_v45 = vsel %vm126_vm1, %v123_v42, %v127_v44 }
  0xfc   :  { %v130_v46 = vsel %vm129_vm2, %v128_v45, 0.0 }
  0xfd   :  { %v131_v47 = vrot.slane %v130_v46, 4 }
  0xff   :  { %v132_v48 = vadd.f32 %v131_v47, %v130_v46 }
 0x101   :  { %v133_v49 = vrot.slane %v132_v48, 2 }
 0x103   :  { %v134_v50 = vadd.f32 %v133_v49, %v132_v48  ;;  %v2101_v49 = vsub.s32 4, %v2005_v17 }
 0x105   :  { %v135_v51 = vrot.slane %v134_v50, 1 }
 0x107   :  { %v136_v52 = vadd.f32 %v135_v51, %v134_v50  ;;  %v2104_v50 = vsub.s32 5, %v2005_v17  ;;  %v268_v51 = vrot.slane %v2020_v23, %v2101_v49 }
 0x109   :  { %v138_v53 = vmul.f32 0.125, %v136_v52 }
 0x10b   :  { %v139_v54 = vsub.f32 %v128_v45, %v138_v53 }
 0x10d   :  { %v140_v55 = vmul.f32 %v139_v54, %v139_v54 }
 0x10f   :  { %v141_v56 = vsel %vm129_vm2, %v140_v55, 0.0 }
 0x110   :  { %v142_v57 = vrot.slane %v141_v56, 4 }
 0x112   :  { %v143_v58 = vadd.f32 %v142_v57, %v141_v56  ;;  %v1443_v57 = vld [vmem:[%s2506_s1 + $0x80] sm:$0xff] }
 0x114   :  { %v144_v59 = vrot.slane %v143_v58, 2 }
 0x116   :  { %v145_v60 = vadd.f32 %v144_v59, %v143_v58  ;;  %v1444_v58 = vld [vmem:[%s2506_s1 + $0x88] sm:$0xff] }
 0x117   :  { %v1801_v59 = vpack.c.bf16 %v1444_v58, %v1443_v57 }
 0x118   :  { %v146_v61 = vrot.slane %v145_v60, 1 }
 0x11a   :  { %v147_v62 = vadd.f32 %v146_v61, %v145_v60  ;;  %v1445_v60 = vld [vmem:[%s2506_s1 + $0x90] sm:$0xff]  ;;  %v1446_v61 = vld [vmem:[%s2506_s1 + $0x98] sm:$0xff] }
 0x11c   :  { %v148_v63 = vmul.f32 0.125, %v147_v62  ;;  %v1804_v62 = vpack.c.bf16 %v1446_v61, %v1445_v60 }
 0x11e   :  { %v149_v1 = vadd.f32 0.01, %v148_v63  ;;  %v1447_v63 = vld [vmem:[%s2506_s1 + $0xa0] sm:$0xff] }
 0x120   :  { %1896 = vrsqrt.f32 %v149_v1  ;;  %v1448_v1 = vld [vmem:[%s2506_s1 + $0xa8] sm:$0xff] }
 0x12a   :  { %v1897_v6 = vpop.eup %1896 }
 0x12b   :  { %v151_v7 = vmul.f32 %v1897_v6, %v139_v54  ;;  %v273_v54 = vrot.slane %v2020_v23, %v2104_v50  ;;  %v1449_v6 = vld [vmem:[%s2506_s1 + $0xb0] sm:$0xff] }
 0x12d   :  { %v156_v9 = vmul.f32 %v155_v5, %v151_v7  ;;  %v1807_v5 = vpack.c.bf16 %v1448_v1, %v1447_v63  ;;  %v1450_v7 = vld [vmem:[%s2506_s1 + $0xb8] sm:$0xff] }
 0x12f   :  { %v161_v10 = vadd.f32 %v160_v8, %v156_v9  ;;  %v1810_v8 = vpack.c.bf16 %v1450_v7, %v1449_v6  ;;  %v1451_v9 = vld [vmem:[%s2506_s1 + $0xc0] sm:$0xff] }
 0x131   :  { %1641 = vmatmul.mubr.msk.f32.vlgmr.msra.gmra.mrb[0].mxu1 %vm129_vm2, %v161_v10  ;;  %v1452_v10 = vld [vmem:[%s2506_s1 + $0xc8] sm:$0xff] }
 0x132   :  { %354 = vmatprep.mubr.f32.mxu1 %v1930_v4  ;;  %1799 = vmatpush1.bf16.msra.mxu1 %v1798_v16  ;;  %v1813_v11 = vpack.c.bf16 %v1452_v10, %v1451_v9  ;;  %v1456_v16 = vld [vmem:[%s2506_s1 + $0xe8] sm:$0xff] }
 0x133   :  { %1800 = vmatprep.subr.bf16.mxu1 %v1928_v0 }
 0x204   :  { %v237_v20 = vpop.f32.mrb[0].mxu1 }
 0x205   :  { %v238_v22 = vadd.f32 %v237_v20, %v167_v19  ;;  %v1642_v24 = vpop.f32.mrb[1].mxu1  ;;  %v1819_v19 = vpack.c.bf16 %v1456_v16, %v1455_v15  ;;  %v1457_v20 = vld [vmem:[%s2506_s1 + $0xf0] sm:$0xff] }
 0x207   :  { %vm241_vm3 = vcmp.ge.f32.partialorder %v238_v22, 0.0  ;;  %v242_v25 = vmul.f32 0.01, %v238_v22 }
 0x209   :  { %v243_v26 = vsel %vm241_vm3, %v238_v22, %v242_v25  ;;  %v1458_v22 = vld [vmem:[%s2506_s1 + $0xf8] sm:$0xff]  ;;  %v2170_v25 = vsub.s32 6, %v2005_v17 }
 0x20a   :  { %v244_v28 = vsel %vm129_vm2, %v243_v26, 0.0  ;;  %v1822_v24 = vpack.c.bf16 %v1458_v22, %v1457_v20 }
 0x20b   :  { %v245_v29 = vrot.slane %v244_v28, 4 }
 0x20d   :  { %v246_v31 = vadd.f32 %v245_v29, %v244_v28 }
 0x20f   :  { %v247_v32 = vrot.slane %v246_v31, 2 }
 0x211   :  { %v248_v33 = vadd.f32 %v247_v32, %v246_v31  ;;  %v370_v32 = vrot.slane %v2040_v30, %v2069_v2  ;;  %v2190_v30 = vld [vmem:[%s2507_s4 + $0x30] sm:$0xff] }
 0x213   :  { %v249_v34 = vrot.slane %v248_v33, 1 }
 0x215   :  { %v250_v35 = vadd.f32 %v249_v34, %v248_v33 }
 0x217   :  { %v251_v37 = vmul.f32 0.125, %v250_v35  ;;  %v24_v35 = vld [vmem:[%s2507_s4 + $0x8] sm:$0xff] }
 0x218   :  { %v286_v17 = vrot.slane %v24_v35, %v2170_v25 }
 0x219   :  { %v252_v38 = vsub.f32 %v243_v26, %v251_v37  ;;  %v282_v26 = vrot.slane %v2020_v23, %v2170_v25  ;;  %v2185_v23 = vld [vmem:[%s2507_s4 + $0x20] sm:$0xff] }
 0x21a   :  { %v504_v15 = vrot.slane %v2185_v23, %v2069_v2  ;;  %v509_v20 = vrot.slane %v2185_v23, %v2072_v3 }
 0x21b   :  { %v253_v39 = vmul.f32 %v252_v38, %v252_v38 }
 0x21d   :  { %v254_v40 = vsel %vm129_vm2, %v253_v39, 0.0 }
 0x21e   :  { %v255_v41 = vrot.slane %v254_v40, 4 }
 0x220   :  { %v256_v42 = vadd.f32 %v255_v41, %v254_v40  ;;  %v379_v40 = vrot.slane %v2185_v23, %v2015_v21 }
 0x222   :  { %v257_v43 = vrot.slane %v256_v42, 2 }
 0x224   :  { %v258_v44 = vadd.f32 %v257_v43, %v256_v42  ;;  %v384_v43 = vrot.slane %v2190_v30, %v2032_v27 }
 0x226   :  { %v259_v45 = vrot.slane %v258_v44, 1 }
 0x228   :  { %v260_v46 = vadd.f32 %v259_v45, %v258_v44 }
 0x22a   :  { %v261_v47 = vmul.f32 0.125, %v260_v46  ;;  %v1460_v46 = vld [vmem:[%s2509_s2 + $0x18] sm:$0xff] }
 0x22c   :  { %v262_v48 = vadd.f32 0.01, %v261_v47 }
 0x22e   :  { %1898 = vrsqrt.f32 %v262_v48  ;;  %v406_v48 = vrot.slane %v2185_v23, %v2032_v27 }
 0x238   :  { %v1899_v52 = vpop.eup %1898 }
 0x239   :  { %v264_v53 = vmul.f32 %v1899_v52, %v252_v38 }
 0x23b   :  { %v269_v55 = vmul.f32 %v268_v51, %v264_v53 }
 0x23d   :  { %v274_v56 = vadd.f32 %v273_v54, %v269_v55 }
 0x23f   :  { %1439 = vmatmul.mubr.msk.f32.vlgmr.msra.gmra.mrb[2].mxu1 %vm129_vm2, %v274_v56 }
 0x240   :  { %1675 = vmatprep.mubr.msk.f32.mxu1 %vm1929_vm0, %v1930_v4  ;;  %1802 = vmatpush3.bf16.msra.mxu1 %v1801_v59 }
 0x241   :  { %1803 = vmatprep.subr.bf16.mxu1 %v1928_v0 }
 0x244   :  { %1805 = vmatpush3.bf16.msra.mxu1 %v1804_v62 }
 0x245   :  { %1806 = vmatprep.subr.bf16.mxu1 %v1928_v0 }
 0x248   :  { %1808 = vmatpush3.bf16.msra.mxu1 %v1807_v5 }
 0x249   :  { %1809 = vmatprep.subr.bf16.mxu1 %v1928_v0 }
 0x24c   :  { %1811 = vmatpush3.bf16.msra.mxu1 %v1810_v8 }
 0x24d   :  { %1812 = vmatprep.subr.bf16.mxu1 %v1928_v0 }
 0x250   :  { %1814 = vmatpush3.bf16.msra.mxu1 %v1813_v11 }
 0x251   :  { %1815 = vmatprep.subr.bf16.mxu1 %v1928_v0 }
 0x254   :  { %1817 = vmatpush3.bf16.msra.mxu1 %v1816_v14 }
 0x255   :  { %1818 = vmatprep.subr.bf16.mxu1 %v1928_v0 }
 0x258   :  { %1820 = vmatpush3.bf16.msra.mxu1 %v1819_v19 }
 0x259   :  { %1821 = vmatprep.subr.bf16.mxu1 %v1928_v0 }
 0x25c   :  { %1823 = vmatpush3.bf16.msra.mxu1 %v1822_v24 }
 0x25d   :  { %1855 = vmatprep.subr.bf16.mxu1 %v1928_v0 }
 0x312   :  { %v356_v28 = vpop.f32.mrb[2].mxu1 }
 0x313   :  { %v357_v29 = vadd.f32 %v356_v28, %v282_v26  ;;  %v358_v31 = vpop.f32.mrb[3].mxu1  ;;  %v1463_v26 = vld [vmem:[%s2510_s3 + $0x28] sm:$0xff]  ;;  %v1465_v28 = vld [vmem:[%s2510_s3 + $0x38] sm:$0xff] }
 0x314   :  { %v359_v38 = vadd.f32 %v358_v31, %v286_v17  ;;  %v1462_v31 = vld [vmem:[%s2510_s3 + $0x20] sm:$0xff] }
 0x315   :  { %1900 = vtanh.f32 %v357_v29  ;;  %v1827_v29 = vpack.c.bf16 %v1465_v28, %v1463_v26  ;;  %v1479_v26 = vld [vmem:[%s2506_s1 + $0x148] sm:$0xff] }
 0x316   :  { %v362_v39 = vadd.f32 %v359_v38, %v2052_v36  ;;  %v1459_v36 = vld [vmem:[%s2509_s2 + $0x10] sm:$0xff] }
 0x317   :  { %v1825_v47 = vpack.c.bf16 %v1460_v46, %v1459_v36 }
 0x319   :  { %1826 = vmatpush3.bf16.msra.mxu0 %v1825_v47 }
 0x31a   :  { %1828 = vmatprep.subr.bf16.mxu0 %v1827_v29  ;;  %v1480_v29 = vld [vmem:[%s2506_s1 + $0x150] sm:$0xff] }
 0x31f   :  { %v1901_v33 = vpop.eup %1900 }
 0x320   :  { %v363_v34 = vmul.f32 1.442695, %v1901_v33  ;;  %v2179_v37 = vadd.f32 %v1901_v33, %v370_v32  ;;  %v1464_v32 = vld [vmem:[%s2510_s3 + $0x30] sm:$0xff] }
 0x321   :  { %v1829_v33 = vpack.c.bf16 %v1464_v32, %v1462_v31  ;;  %v1481_v31 = vld [vmem:[%s2506_s1 + $0x158] sm:$0xff] }
 0x322   :  { %1902 = vpow2.f32 %v363_v34  ;;  %v517_v34 = vrot.slane %v2185_v23, %v2094_v18  ;;  %v1847_v32 = vpack.c.bf16 %v1481_v31, %v1480_v29 }
 0x32c   :  { %v1903_v41 = vpop.eup %1902 }
 0x32d   :  { %v365_v42 = vmul.f32 %v1903_v41, %v362_v39 }
 0x32f   :  { %v380_v44 = vadd.f32 %v379_v40, %v365_v42 }
 0x331   :  { %v2197_v45 = vmul.f32 %v384_v43, %v380_v44 }
 0x333   :  { %1676 = vmatmul.mubr.f32.vlgmr.msra.gmra.mrb[4].mxu1 %v2197_v45 }
 0x334   :  { %1724 = vmatprep.mubr.msk.f32.mxu1 %vm1929_vm0, %v1930_v4 }
 0x406   :  { %v473_v51 = vpop.f32.mrb[4].mxu1 }
 0x407   :  { %v474_v52 = vadd.f32 %v473_v51, %v406_v48  ;;  %v1677_v53 = vpop.f32.mrb[5].mxu1 }
 0x409   :  { %vm477_vm4 = vcmp.ge.f32.partialorder %v474_v52, 0.0  ;;  %v478_v54 = vmul.f32 0.01, %v474_v52 }
 0x40b   :  { %v479_v55 = vsel %vm477_vm4, %v474_v52, %v478_v54 }
 0x40c   :  { %v480_v56 = vsel %vm129_vm2, %v479_v55, 0.0 }
 0x40d   :  { %v481_v57 = vrot.slane %v480_v56, 4 }
 0x40f   :  { %v482_v58 = vadd.f32 %v481_v57, %v480_v56 }
 0x411   :  { %v483_v59 = vrot.slane %v482_v58, 2 }
 0x413   :  { %v484_v60 = vadd.f32 %v483_v59, %v482_v58 }
 0x415   :  { %v485_v61 = vrot.slane %v484_v60, 1 }
 0x417   :  { %v486_v62 = vadd.f32 %v485_v61, %v484_v60 }
 0x419   :  { %v487_v63 = vmul.f32 0.125, %v486_v62  ;;  %v618_v62 = vrot.slane %v2185_v23, %v2101_v49 }
 0x41b   :  { %v488_v1 = vsub.f32 %v479_v55, %v487_v63 }
 0x41d   :  { %v489_v5 = vmul.f32 %v488_v1, %v488_v1 }
 0x41f   :  { %v490_v6 = vsel %vm129_vm2, %v489_v5, 0.0  ;;  %v623_v5 = vrot.slane %v2185_v23, %v2104_v50 }
 0x420   :  { %v491_v7 = vrot.slane %v490_v6, 4 }
 0x422   :  { %v492_v8 = vadd.f32 %v491_v7, %v490_v6 }
 0x424   :  { %v493_v9 = vrot.slane %v492_v8, 2 }
 0x426   :  { %v494_v10 = vadd.f32 %v493_v9, %v492_v8  ;;  %v1470_v8 = vld [vmem:[%s2506_s1 + $0x100] sm:$0xff]  ;;  %v1471_v9 = vld [vmem:[%s2506_s1 + $0x108] sm:$0xff] }
 0x428   :  { %v495_v11 = vrot.slane %v494_v10, 1 }
 0x42a   :  { %v496_v12 = vadd.f32 %v495_v11, %v494_v10  ;;  %v1832_v10 = vpack.c.bf16 %v1471_v9, %v1470_v8  ;;  %v1472_v11 = vld [vmem:[%s2506_s1 + $0x110] sm:$0xff] }
 0x42c   :  { %v497_v13 = vmul.f32 0.125, %v496_v12  ;;  %v1473_v12 = vld [vmem:[%s2506_s1 + $0x118] sm:$0xff] }
 0x42e   :  { %v498_v14 = vadd.f32 0.01, %v497_v13  ;;  %v1835_v13 = vpack.c.bf16 %v1473_v12, %v1472_v11 }
 0x430   :  { %1904 = vrsqrt.f32 %v498_v14  ;;  %v1474_v14 = vld [vmem:[%s2506_s1 + $0x120] sm:$0xff] }
 0x43a   :  { %v1905_v16 = vpop.eup %1904 }
 0x43b   :  { %v500_v19 = vmul.f32 %v1905_v16, %v488_v1 }
 0x43d   :  { %v505_v22 = vmul.f32 %v504_v15, %v500_v19  ;;  %v1475_v15 = vld [vmem:[%s2506_s1 + $0x128] sm:$0xff]  ;;  %v1476_v19 = vld [vmem:[%s2506_s1 + $0x130] sm:$0xff] }
 0x43e   :  { %v1838_v16 = vpack.c.bf16 %v1475_v15, %v1474_v14 }
 0x43f   :  { %v510_v24 = vadd.f32 %v509_v20, %v505_v22  ;;  %v1477_v20 = vld [vmem:[%s2506_s1 + $0x138] sm:$0xff] }
 0x440   :  { %v1841_v22 = vpack.c.bf16 %v1477_v20, %v1476_v19 }
 0x441   :  { %1683 = vmatmul.mubr.msk.f32.vlgmr.msra.gmra.mrb[2].mxu0 %vm129_vm2, %v510_v24  ;;  %v1478_v24 = vld [vmem:[%s2506_s1 + $0x140] sm:$0xff] }
 0x442   :  { %705 = vmatprep.mubr.f32.mxu0 %v1930_v4  ;;  %1830 = vmatpush1.bf16.msra.mxu0 %v1829_v33  ;;  %v1844_v28 = vpack.c.bf16 %v1479_v26, %v1478_v24  ;;  %v1482_v33 = vld [vmem:[%s2506_s1 + $0x160] sm:$0xff] }
 0x443   :  { %1831 = vmatprep.subr.bf16.mxu0 %v1928_v0 }
 0x514   :  { %v587_v35 = vpop.f32.mrb[2].mxu0 }
 0x515   :  { %v588_v17 = vadd.f32 %v587_v35, %v517_v34  ;;  %v1684_v38 = vpop.f32.mrb[3].mxu0  ;;  %v1483_v34 = vld [vmem:[%s2506_s1 + $0x168] sm:$0xff] }
 0x516   :  { %v1850_v35 = vpack.c.bf16 %v1483_v34, %v1482_v33  ;;  %v1485_v38 = vld [vmem:[%s2506_s1 + $0x178] sm:$0xff] }
 0x517   :  { %vm591_vm5 = vcmp.ge.f32.partialorder %v588_v17, 0.0  ;;  %v592_v39 = vmul.f32 0.01, %v588_v17 }
 0x519   :  { %v593_v40 = vsel %vm591_vm5, %v588_v17, %v592_v39  ;;  %v1484_v17 = vld [vmem:[%s2506_s1 + $0x170] sm:$0xff] }
 0x51a   :  { %v594_v41 = vsel %vm129_vm2, %v593_v40, 0.0  ;;  %v1853_v39 = vpack.c.bf16 %v1485_v38, %v1484_v17 }
 0x51b   :  { %v595_v42 = vrot.slane %v594_v41, 4 }
 0x51d   :  { %v596_v43 = vadd.f32 %v595_v42, %v594_v41 }
 0x51f   :  { %v597_v44 = vrot.slane %v596_v43, 2 }
 0x521   :  { %v598_v36 = vadd.f32 %v597_v44, %v596_v43 }
 0x523   :  { %v599_v46 = vrot.slane %v598_v36, 1 }
 0x525   :  { %v600_v47 = vadd.f32 %v599_v46, %v598_v36  ;;  %v1441_v46 = vld [vmem:[%s2507_s4 + $0x28] sm:$0xff] }
 0x527   :  { %v601_v48 = vmul.f32 0.125, %v600_v47 }
 0x529   :  { %v602_v51 = vsub.f32 %v593_v40, %v601_v48  ;;  %v633_v40 = vrot.slane %v2185_v23, %v2170_v25  ;;  %v637_v48 = vrot.slane %v1441_v46, %v2170_v25  ;;  %v2310_v23 = vld [vmem:[%s2507_s4 + $0x40] sm:$0xff] }
 0x52a   :  { %v855_v33 = vrot.slane %v2310_v23, %v2069_v2  ;;  %v860_v17 = vrot.slane %v2310_v23, %v2072_v3  ;;  %v868_v46 = vrot.slane %v2310_v23, %v2094_v18 }
 0x52b   :  { %v603_v52 = vmul.f32 %v602_v51, %v602_v51 }
 0x52d   :  { %v604_v53 = vsel %vm129_vm2, %v603_v52, 0.0  ;;  %v2315_v52 = vld [vmem:[%s2507_s4 + $0x50] sm:$0xff] }
 0x52e   :  { %v605_v54 = vrot.slane %v604_v53, 4 }
 0x530   :  { %v606_v55 = vadd.f32 %v605_v54, %v604_v53 }
 0x532   :  { %v607_v56 = vrot.slane %v606_v55, 2 }
 0x534   :  { %v608_v57 = vadd.f32 %v607_v56, %v606_v55  ;;  %v735_v56 = vrot.slane %v2315_v52, %v2032_v27 }
 0x536   :  { %v609_v58 = vrot.slane %v608_v57, 1 }
 0x538   :  { %v610_v59 = vadd.f32 %v609_v58, %v608_v57 }
 0x53a   :  { %v611_v60 = vmul.f32 0.125, %v610_v59  ;;  %v1487_v59 = vld [vmem:[%s2509_s2 + $0x28] sm:$0xff] }
 0x53c   :  { %v612_v61 = vadd.f32 0.01, %v611_v60 }
 0x53e   :  { %1906 = vrsqrt.f32 %v612_v61  ;;  %v757_v61 = vrot.slane %v2310_v23, %v2032_v27 }
 0x548   :  { %v1907_v63 = vpop.eup %1906 }
 0x549   :  { %v614_v1 = vmul.f32 %v1907_v63, %v602_v51 }
 0x54b   :  { %v619_v6 = vmul.f32 %v618_v62, %v614_v1 }
 0x54d   :  { %v624_v7 = vadd.f32 %v623_v5, %v619_v6 }
 0x54f   :  { %1466 = vmatmul.mubr.msk.f32.vlgmr.msra.gmra.mrb[4].mxu0 %vm129_vm2, %v624_v7 }
 0x550   :  { %1717 = vmatprep.mubr.msk.f32.mxu0 %vm1929_vm0, %v1930_v4  ;;  %1833 = vmatpush3.bf16.msra.mxu0 %v1832_v10 }
 0x551   :  { %1834 = vmatprep.subr.bf16.mxu0 %v1928_v0 }
 0x554   :  { %1836 = vmatpush3.bf16.msra.mxu0 %v1835_v13 }
 0x555   :  { %1837 = vmatprep.subr.bf16.mxu0 %v1928_v0 }
 0x558   :  { %1839 = vmatpush3.bf16.msra.mxu0 %v1838_v16 }
 0x559   :  { %1840 = vmatprep.subr.bf16.mxu0 %v1928_v0 }
 0x55c   :  { %1842 = vmatpush3.bf16.msra.mxu0 %v1841_v22 }
 0x55d   :  { %1843 = vmatprep.subr.bf16.mxu0 %v1928_v0 }
 0x560   :  { %1845 = vmatpush3.bf16.msra.mxu0 %v1844_v28 }
 0x561   :  { %1846 = vmatprep.subr.bf16.mxu0 %v1928_v0 }
 0x564   :  { %1848 = vmatpush3.bf16.msra.mxu0 %v1847_v32 }
 0x565   :  { %1849 = vmatprep.subr.bf16.mxu0 %v1928_v0 }
 0x568   :  { %1851 = vmatpush3.bf16.msra.mxu0 %v1850_v35 }
 0x569   :  { %1852 = vmatprep.subr.bf16.mxu0 %v1928_v0 }
 0x56c   :  { %1854 = vmatpush3.bf16.msra.mxu0 %v1853_v39 }
 0x56d   :  { %1886 = vmatprep.subr.bf16.mxu0 %v1928_v0 }
 0x622   :  { %v707_v41 = vpop.f32.mrb[4].mxu0 }
 0x623   :  { %v708_v42 = vadd.f32 %v707_v41, %v633_v40  ;;  %v709_v43 = vpop.f32.mrb[5].mxu0  ;;  %v1490_v40 = vld [vmem:[%s2510_s3 + $0x48] sm:$0xff]  ;;  %v1492_v41 = vld [vmem:[%s2510_s3 + $0x58] sm:$0xff] }
 0x624   :  { %v710_v51 = vadd.f32 %v709_v43, %v637_v48  ;;  %v1489_v43 = vld [vmem:[%s2510_s3 + $0x40] sm:$0xff] }
 0x625   :  { %1908 = vtanh.f32 %v708_v42  ;;  %v1858_v42 = vpack.c.bf16 %v1492_v41, %v1490_v40  ;;  %v1505_v40 = vld [vmem:[%s2506_s1 + $0x1c0] sm:$0xff]  ;;  %v1506_v41 = vld [vmem:[%s2506_s1 + $0x1c8] sm:$0xff] }
 0x626   :  { %v713_v53 = vadd.f32 %v710_v51, %v2197_v45  ;;  %v1486_v45 = vld [vmem:[%s2509_s2 + $0x20] sm:$0xff] }
 0x627   :  { %v1856_v60 = vpack.c.bf16 %v1487_v59, %v1486_v45 }
 0x629   :  { %1857 = vmatpush3.bf16.msra.mxu1 %v1856_v60 }
 0x62a   :  { %1859 = vmatprep.subr.bf16.mxu1 %v1858_v42  ;;  %v1875_v42 = vpack.c.bf16 %v1506_v41, %v1505_v40 }
 0x62f   :  { %v1909_v44 = vpop.eup %1908 }
 0x630   :  { %v714_v36 = vmul.f32 1.442695, %v1909_v44  ;;  %v2304_v47 = vadd.f32 %v1909_v44, %v2179_v37  ;;  %v730_v37 = vrot.slane %v2310_v23, %v2015_v21  ;;  %v1491_v44 = vld [vmem:[%s2510_s3 + $0x50] sm:$0xff] }
 0x632   :  { %1910 = vpow2.f32 %v714_v36  ;;  %v1860_v36 = vpack.c.bf16 %v1491_v44, %v1489_v43  ;;  %v1507_v43 = vld [vmem:[%s2506_s1 + $0x1d0] sm:$0xff]  ;;  %v1508_v44 = vld [vmem:[%s2506_s1 + $0x1d8] sm:$0xff] }
 0x63c   :  { %v1911_v54 = vpop.eup %1910 }
 0x63d   :  { %v716_v55 = vmul.f32 %v1911_v54, %v713_v53 }
 0x63f   :  { %v731_v57 = vadd.f32 %v730_v37, %v716_v55 }
 0x641   :  { %v2322_v58 = vmul.f32 %v735_v56, %v731_v57 }
 0x643   :  { %1718 = vmatmul.mubr.f32.vlgmr.msra.gmra.mrb[6].mxu0 %v2322_v58 }
 0x644   :  { %1766 = vmatprep.mubr.msk.f32.mxu0 %vm1929_vm0, %v1930_v4 }
 0x716   :  { %v824_v62 = vpop.f32.mrb[6].mxu0 }
 0x717   :  { %v825_v63 = vadd.f32 %v824_v62, %v757_v61  ;;  %v1719_v1 = vpop.f32.mrb[7].mxu0 }
 0x719   :  { %vm828_vm6 = vcmp.ge.f32.partialorder %v825_v63, 0.0  ;;  %v829_v5 = vmul.f32 0.01, %v825_v63 }
 0x71b   :  { %v830_v6 = vsel %vm828_vm6, %v825_v63, %v829_v5 }
 0x71c   :  { %v831_v7 = vsel %vm129_vm2, %v830_v6, 0.0 }
 0x71d   :  { %v832_v8 = vrot.slane %v831_v7, 4 }
 0x71f   :  { %v833_v9 = vadd.f32 %v832_v8, %v831_v7 }
 0x721   :  { %v834_v10 = vrot.slane %v833_v9, 2 }
 0x723   :  { %v835_v11 = vadd.f32 %v834_v10, %v833_v9 }
 0x725   :  { %v836_v12 = vrot.slane %v835_v11, 1 }
 0x727   :  { %v837_v13 = vadd.f32 %v836_v12, %v835_v11 }
 0x729   :  { %v838_v14 = vmul.f32 0.125, %v837_v13 }
 0x72b   :  { %v839_v15 = vsub.f32 %v830_v6, %v838_v14  ;;  %v969_v14 = vrot.slane %v2310_v23, %v2101_v49 }
 0x72d   :  { %v840_v16 = vmul.f32 %v839_v15, %v839_v15 }
 0x72f   :  { %v841_v19 = vsel %vm129_vm2, %v840_v16, 0.0 }
 0x730   :  { %v842_v20 = vrot.slane %v841_v19, 4 }
 0x732   :  { %v843_v22 = vadd.f32 %v842_v20, %v841_v19  ;;  %v974_v19 = vrot.slane %v2310_v23, %v2104_v50 }
 0x734   :  { %v844_v24 = vrot.slane %v843_v22, 2 }
 0x736   :  { %v845_v26 = vadd.f32 %v844_v24, %v843_v22  ;;  %v1497_v24 = vld [vmem:[%s2506_s1 + $0x180] sm:$0xff] }
 0x738   :  { %v846_v28 = vrot.slane %v845_v26, 1 }
 0x73a   :  { %v847_v29 = vadd.f32 %v846_v28, %v845_v26  ;;  %v1498_v26 = vld [vmem:[%s2506_s1 + $0x188] sm:$0xff] }
 0x73b   :  { %v1863_v28 = vpack.c.bf16 %v1498_v26, %v1497_v24 }
 0x73c   :  { %v848_v31 = vmul.f32 0.125, %v847_v29  ;;  %v1499_v29 = vld [vmem:[%s2506_s1 + $0x190] sm:$0xff] }
 0x73e   :  { %v849_v32 = vadd.f32 0.01, %v848_v31  ;;  %v1500_v31 = vld [vmem:[%s2506_s1 + $0x198] sm:$0xff] }
 0x740   :  { %1912 = vrsqrt.f32 %v849_v32  ;;  %v1866_v32 = vpack.c.bf16 %v1500_v31, %v1499_v29 }
 0x74a   :  { %v1913_v34 = vpop.eup %1912 }
 0x74b   :  { %v851_v35 = vmul.f32 %v1913_v34, %v839_v15  ;;  %v1502_v34 = vld [vmem:[%s2506_s1 + $0x1a8] sm:$0xff] }
 0x74d   :  { %v856_v38 = vmul.f32 %v855_v33, %v851_v35  ;;  %v1501_v33 = vld [vmem:[%s2506_s1 + $0x1a0] sm:$0xff] }
 0x74e   :  { %v1869_v35 = vpack.c.bf16 %v1502_v34, %v1501_v33 }
 0x74f   :  { %v861_v39 = vadd.f32 %v860_v17, %v856_v38  ;;  %v1503_v17 = vld [vmem:[%s2506_s1 + $0x1b0] sm:$0xff]  ;;  %v1504_v38 = vld [vmem:[%s2506_s1 + $0x1b8] sm:$0xff] }
 0x751   :  { %1725 = vmatmul.mubr.msk.f32.vlgmr.msra.gmra.mrb[6].mxu1 %vm129_vm2, %v861_v39  ;;  %v1872_v39 = vpack.c.bf16 %v1504_v38, %v1503_v17 }
 0x752   :  { %1056 = vmatprep.mubr.f32.mxu1 %v1930_v4  ;;  %1861 = vmatpush1.bf16.msra.mxu1 %v1860_v36  ;;  %v1878_v36 = vpack.c.bf16 %v1508_v44, %v1507_v43 }
 0x753   :  { %1862 = vmatprep.subr.bf16.mxu1 %v1928_v0 }
 0x824   :  { %v938_v48 = vpop.f32.mrb[6].mxu1 }
 0x825   :  { %v939_v51 = vadd.f32 %v938_v48, %v868_v46  ;;  %v1726_v53 = vpop.f32.mrb[7].mxu1  ;;  %v1509_v46 = vld [vmem:[%s2506_s1 + $0x1e0] sm:$0xff]  ;;  %v1510_v48 = vld [vmem:[%s2506_s1 + $0x1e8] sm:$0xff] }
 0x826   :  { %v1511_v53 = vld [vmem:[%s2506_s1 + $0x1f0] sm:$0xff] }
 0x827   :  { %vm942_vm7 = vcmp.ge.f32.partialorder %v939_v51, 0.0  ;;  %v943_v37 = vmul.f32 0.01, %v939_v51 }
 0x829   :  { %v944_v54 = vsel %vm942_vm7, %v939_v51, %v943_v37  ;;  %v1881_v51 = vpack.c.bf16 %v1510_v48, %v1509_v46  ;;  %v1512_v37 = vld [vmem:[%s2506_s1 + $0x1f8] sm:$0xff] }
 0x82a   :  { %v945_v55 = vsel %vm129_vm2, %v944_v54, 0.0 }
 0x82b   :  { %v946_v56 = vrot.slane %v945_v55, 4 }
 0x82d   :  { %v947_v57 = vadd.f32 %v946_v56, %v945_v55  ;;  %v984_v55 = vrot.slane %v2310_v23, %v2170_v25 }
 0x82f   :  { %v948_v45 = vrot.slane %v947_v57, 2 }
 0x831   :  { %v949_v59 = vadd.f32 %v948_v45, %v947_v57 }
 0x833   :  { %v950_v60 = vrot.slane %v949_v59, 1 }
 0x835   :  { %v951_v61 = vadd.f32 %v950_v60, %v949_v59 }
 0x837   :  { %v952_v62 = vmul.f32 0.125, %v951_v61 }
 0x839   :  { %v953_v63 = vsub.f32 %v944_v54, %v952_v62  ;;  %v1884_v54 = vpack.c.bf16 %v1512_v37, %v1511_v53  ;;  %v1468_v62 = vld [vmem:[%s2507_s4 + $0x48] sm:$0xff] }
 0x83a   :  { %v988_v23 = vrot.slane %v1468_v62, %v2170_v25 }
 0x83b   :  { %v954_v1 = vmul.f32 %v953_v63, %v953_v63 }
 0x83d   :  { %v955_v5 = vsel %vm129_vm2, %v954_v1, 0.0 }
 0x83e   :  { %v956_v6 = vrot.slane %v955_v5, 4 }
 0x840   :  { %v957_v7 = vadd.f32 %v956_v6, %v955_v5  ;;  %v2436_v5 = vld [vmem:[%s2507_s4 + $0x60] sm:$0xff] }
 0x841   :  { %v1081_v6 = vrot.slane %v2436_v5, %v2015_v21  ;;  %v1108_v21 = vrot.slane %v2436_v5, %v2032_v27 }
 0x842   :  { %v958_v8 = vrot.slane %v957_v7, 2 }
 0x844   :  { %v959_v9 = vadd.f32 %v958_v8, %v957_v7 }
 0x846   :  { %v960_v10 = vrot.slane %v959_v9, 1 }
 0x848   :  { %v961_v11 = vadd.f32 %v960_v10, %v959_v9 }
 0x84a   :  { %v962_v12 = vmul.f32 0.125, %v961_v11 }
 0x84c   :  { %v963_v13 = vadd.f32 0.01, %v962_v12  ;;  %v1513_v12 = vld [vmem:[%s2509_s2 + $0x30] sm:$0xff] }
 0x84e   :  { %1914 = vrsqrt.f32 %v963_v13 }
 0x858   :  { %v1915_v15 = vpop.eup %1914 }
 0x859   :  { %v965_v16 = vmul.f32 %v1915_v15, %v953_v63 }
 0x85b   :  { %v970_v20 = vmul.f32 %v969_v14, %v965_v16 }
 0x85d   :  { %v975_v22 = vadd.f32 %v974_v19, %v970_v20 }
 0x85f   :  { %1493 = vmatmul.mubr.msk.f32.vlgmr.msra.gmra.mrb[8].mxu1 %vm129_vm2, %v975_v22 }
 0x860   :  { %1759 = vmatprep.mubr.msk.f32.mxu1 %vm1929_vm0, %v1930_v4  ;;  %1864 = vmatpush3.bf16.msra.mxu1 %v1863_v28 }
 0x861   :  { %1865 = vmatprep.subr.bf16.mxu1 %v1928_v0 }
 0x864   :  { %1867 = vmatpush3.bf16.msra.mxu1 %v1866_v32 }
 0x865   :  { %1868 = vmatprep.subr.bf16.mxu1 %v1928_v0 }
 0x868   :  { %1870 = vmatpush3.bf16.msra.mxu1 %v1869_v35 }
 0x869   :  { %1871 = vmatprep.subr.bf16.mxu1 %v1928_v0 }
 0x86c   :  { %1873 = vmatpush3.bf16.msra.mxu1 %v1872_v39 }
 0x86d   :  { %1874 = vmatprep.subr.bf16.mxu1 %v1928_v0 }
 0x870   :  { %1876 = vmatpush3.bf16.msra.mxu1 %v1875_v42 }
 0x871   :  { %1877 = vmatprep.subr.bf16.mxu1 %v1928_v0 }
 0x874   :  { %1879 = vmatpush3.bf16.msra.mxu1 %v1878_v36  ;;  %v1206_v36 = vrot.slane %v2436_v5, %v2069_v2 }
 0x875   :  { %1880 = vmatprep.subr.bf16.mxu1 %v1928_v0 }
 0x878   :  { %1882 = vmatpush3.bf16.msra.mxu1 %v1881_v51  ;;  %v1211_v51 = vrot.slane %v2436_v5, %v2072_v3  ;;  %v1518_v3 = vld [vmem:[%s2510_s3 + $0x70] sm:$0xff] }
 0x879   :  { %1883 = vmatprep.subr.bf16.mxu1 %v1928_v0  ;;  %v721_v0 = vrot.slane %v2190_v30, %v2069_v2  ;;  %v2441_v30 = vld [vmem:[%s2507_s4 + $0x70] sm:$0xff] }
 0x87a   :  { %v1086_v9 = vrot.slane %v2441_v30, %v2032_v27 }
 0x87b   :  { %v722_v59 = vadd.f32 %v721_v0, %v2304_v47 }
 0x87c   :  { %1885 = vmatpush3.bf16.msra.mxu1 %v1884_v54  ;;  %v1517_v54 = vld [vmem:[%s2510_s3 + $0x68] sm:$0xff] }
 0x932   :  { %v1058_v56 = vpop.f32.mrb[8].mxu1 }
 0x933   :  { %v1059_v57 = vadd.f32 %v1058_v56, %v984_v55  ;;  %v1060_v45 = vpop.f32.mrb[9].mxu1  ;;  %v1519_v55 = vld [vmem:[%s2510_s3 + $0x78] sm:$0xff] }
 0x934   :  { %v1061_v1 = vadd.f32 %v1060_v45, %v988_v23  ;;  %v1889_v56 = vpack.c.bf16 %v1519_v55, %v1517_v54 }
 0x935   :  { %1916 = vtanh.f32 %v1059_v57  ;;  %v1516_v57 = vld [vmem:[%s2510_s3 + $0x60] sm:$0xff] }
 0x936   :  { %v1064_v47 = vadd.f32 %v1061_v1, %v2322_v58  ;;  %v1514_v58 = vld [vmem:[%s2509_s2 + $0x38] sm:$0xff]  ;;  %v1891_v45 = vpack.c.bf16 %v1518_v3, %v1516_v57 }
 0x937   :  { %v1887_v13 = vpack.c.bf16 %v1514_v58, %v1513_v12 }
 0x939   :  { %1888 = vmatpush3.bf16.msra.mxu0 %v1887_v13 }
 0x93a   :  { %1890 = vmatprep.subr.bf16.mxu0 %v1889_v56 }
 0x93f   :  { %v1917_v60 = vpop.eup %1916 }
 0x940   :  { %v1065_v61 = vmul.f32 1.442695, %v1917_v60  ;;  %v2430_v63 = vadd.f32 %v1917_v60, %v722_v59 }
 0x942   :  { %1918 = vpow2.f32 %v1065_v61 }
 0x94c   :  { %v1919_v7 = vpop.eup %1918 }
 0x94d   :  { %v1067_v8 = vmul.f32 %v1919_v7, %v1064_v47 }
 0x94f   :  { %v1082_v10 = vadd.f32 %v1081_v6, %v1067_v8 }
 0x951   :  { %v2448_v11 = vmul.f32 %v1086_v9, %v1082_v10 }
 0x953   :  { %1760 = vmatmul.mubr.f32.vlgmr.msra.gmra.mrb[10].mxu1 %v2448_v11 }
 0xa26   :  { %v1175_v14 = vpop.f32.mrb[10].mxu1 }
 0xa27   :  { %v1176_v15 = vadd.f32 %v1175_v14, %v1108_v21  ;;  %v1761_v16 = vpop.f32.mrb[11].mxu1 }
 0xa29   :  { %vm1179_vm8 = vcmp.ge.f32.partialorder %v1176_v15, 0.0  ;;  %v1180_v19 = vmul.f32 0.01, %v1176_v15 }
 0xa2b   :  { %v1181_v20 = vsel %vm1179_vm8, %v1176_v15, %v1180_v19 }
 0xa2c   :  { %v1182_v22 = vsel %vm129_vm2, %v1181_v20, 0.0 }
 0xa2d   :  { %v1183_v24 = vrot.slane %v1182_v22, 4 }
 0xa2f   :  { %v1184_v26 = vadd.f32 %v1183_v24, %v1182_v22  ;;  %v1320_v24 = vrot.slane %v2436_v5, %v2101_v49 }
 0xa31   :  { %v1185_v28 = vrot.slane %v1184_v26, 2 }
 0xa33   :  { %v1186_v29 = vadd.f32 %v1185_v28, %v1184_v26 }
 0xa35   :  { %v1187_v31 = vrot.slane %v1186_v29, 1 }
 0xa37   :  { %v1188_v32 = vadd.f32 %v1187_v31, %v1186_v29  ;;  %v1325_v29 = vrot.slane %v2436_v5, %v2104_v50 }
 0xa39   :  { %v1189_v33 = vmul.f32 0.125, %v1188_v32 }
 0xa3b   :  { %v1190_v34 = vsub.f32 %v1181_v20, %v1189_v33  ;;  %v1335_v33 = vrot.slane %v2436_v5, %v2170_v25 }
 0xa3d   :  { %v1191_v35 = vmul.f32 %v1190_v34, %v1190_v34 }
 0xa3f   :  { %v1192_v17 = vsel %vm129_vm2, %v1191_v35, 0.0 }
 0xa40   :  { %v1193_v27 = vrot.slane %v1192_v17, 4 }
 0xa42   :  { %v1194_v38 = vadd.f32 %v1193_v27, %v1192_v17  ;;  %v1072_v27 = vrot.slane %v2315_v52, %v2069_v2 }
 0xa44   :  { %v1195_v39 = vrot.slane %v1194_v38, 2  ;;  %v1073_v49 = vadd.f32 %v1072_v27, %v2430_v63 }
 0xa46   :  { %v1196_v40 = vadd.f32 %v1195_v39, %v1194_v38  ;;  %v1423_v38 = vrot.slane %v2441_v30, %v2069_v2 }
 0xa48   :  { %v1197_v41 = vrot.slane %v1196_v40, 1 }
 0xa4a   :  { %v1198_v42 = vadd.f32 %v1197_v41, %v1196_v40  ;;  %v1495_v40 = vld [vmem:[%s2507_s4 + $0x68] sm:$0xff] }
 0xa4c   :  { %v1199_v43 = vmul.f32 0.125, %v1198_v42  ;;  %v1339_v42 = vrot.slane %v1495_v40, %v2170_v25 }
 0xa4e   :  { %v1200_v44 = vadd.f32 0.01, %v1199_v43 }
 0xa50   :  { %1920 = vrsqrt.f32 %v1200_v44 }
 0xa5a   :  { %v1921_v46 = vpop.eup %1920 }
 0xa5b   :  { %v1202_v48 = vmul.f32 %v1921_v46, %v1190_v34 }
 0xa5d   :  { %v1207_v53 = vmul.f32 %v1206_v36, %v1202_v48 }
 0xa5f   :  { %v1212_v37 = vadd.f32 %v1211_v51, %v1207_v53 }
 0xa61   :  { %1767 = vmatmul.mubr.msk.f32.vlgmr.msra.gmra.mrb[8].mxu0 %vm129_vm2, %v1212_v37 }
 0xa62   :  { %1407 = vmatprep.mubr.f32.mxu0 %v1930_v4  ;;  %1892 = vmatpush1.bf16.msra.mxu0 %v1891_v45  ;;  %v1219_v4 = vrot.slane %v2436_v5, %v2094_v18 }
 0xb34   :  { %v1289_v0 = vpop.f32.mrb[8].mxu0 }
 0xb35   :  { %v1290_v59 = vadd.f32 %v1289_v0, %v1219_v4  ;;  %v1768_v60 = vpop.f32.mrb[9].mxu0 }
 0xb37   :  { %vm1293_vm9 = vcmp.ge.f32.partialorder %v1290_v59, 0.0  ;;  %v1294_v61 = vmul.f32 0.01, %v1290_v59 }
 0xb39   :  { %v1295_v62 = vsel %vm1293_vm9, %v1290_v59, %v1294_v61 }
 0xb3a   :  { %v1296_v23 = vsel %vm129_vm2, %v1295_v62, 0.0 }
 0xb3b   :  { %v1297_v1 = vrot.slane %v1296_v23, 4 }
 0xb3d   :  { %v1298_v47 = vadd.f32 %v1297_v1, %v1296_v23 }
 0xb3f   :  { %v1299_v6 = vrot.slane %v1298_v47, 2 }
 0xb41   :  { %v1300_v7 = vadd.f32 %v1299_v6, %v1298_v47 }
 0xb43   :  { %v1301_v8 = vrot.slane %v1300_v7, 1 }
 0xb45   :  { %v1302_v9 = vadd.f32 %v1301_v8, %v1300_v7 }
 0xb47   :  { %v1303_v10 = vmul.f32 0.125, %v1302_v9 }
 0xb49   :  { %v1304_v12 = vsub.f32 %v1295_v62, %v1303_v10 }
 0xb4b   :  { %v1305_v58 = vmul.f32 %v1304_v12, %v1304_v12 }
 0xb4d   :  { %v1306_v13 = vsel %vm129_vm2, %v1305_v58, 0.0 }
 0xb4e   :  { %v1307_v18 = vrot.slane %v1306_v13, 4 }
 0xb50   :  { %v1308_v21 = vadd.f32 %v1307_v18, %v1306_v13 }
 0xb52   :  { %v1309_v14 = vrot.slane %v1308_v21, 2 }
 0xb54   :  { %v1310_v15 = vadd.f32 %v1309_v14, %v1308_v21 }
 0xb56   :  { %v1311_v16 = vrot.slane %v1310_v15, 1 }
 0xb58   :  { %v1312_v19 = vadd.f32 %v1311_v16, %v1310_v15 }
 0xb5a   :  { %v1313_v20 = vmul.f32 0.125, %v1312_v19 }
 0xb5c   :  { %v1314_v22 = vadd.f32 0.01, %v1313_v20 }
 0xb5e   :  { %1922 = vrsqrt.f32 %v1314_v22 }
 0xb68   :  { %v1923_v26 = vpop.eup %1922 }
 0xb69   :  { %v1316_v28 = vmul.f32 %v1923_v26, %v1304_v12 }
 0xb6b   :  { %v1321_v31 = vmul.f32 %v1320_v24, %v1316_v28 }
 0xb6d   :  { %v1326_v32 = vadd.f32 %v1325_v29, %v1321_v31 }
 0xb6f   :  { %1520 = vmatmul.mubr.msk.f32.vlgmr.msra.gmra.mrb[10].mxu0 %vm129_vm2, %v1326_v32 }
 0xc42   :  { %v1409_v34 = vpop.f32.mrb[10].mxu0 }
 0xc43   :  { %v1410_v35 = vadd.f32 %v1409_v34, %v1335_v33  ;;  %v1411_v17 = vpop.f32.mrb[11].mxu0 }
 0xc44   :  { %v1412_v43 = vadd.f32 %v1411_v17, %v1339_v42 }
 0xc45   :  { %1924 = vtanh.f32 %v1410_v35 }
 0xc46   :  { %v1415_v52 = vadd.f32 %v1412_v43, %v2448_v11 }
 0xc4f   :  { %v1925_v50 = vpop.eup %1924 }
 0xc50   :  { %v1416_v39 = vmul.f32 1.442695, %v1925_v50  ;;  %v1419_v41 = vadd.f32 %v1925_v50, %v1073_v49 }
 0xc52   :  { %1926 = vpow2.f32 %v1416_v39  ;;  %v1424_v5 = vadd.f32 %v1423_v38, %v1419_v41 }
 0xc54   :  { %1426 = vadd.xlane.f32.xlu0 %v1424_v5 }
 0xc5c   :  { %v1927_v44 = vpop.eup %1926 }
 0xc5d   :  { %v1418_v63 = vmul.f32 %v1927_v44, %v1415_v52 }
 0xc5f   :  { %1425 = vst [vmem:[%s2511_s5] sm:$0xff] %v1418_v63 }
 0xce1   :  { %v1427_v2 = vpop.xlane.xlu0 %1426 }
 0xce2   :  { %1429 = vst.msk [vmem:[%s2512_s6] sm:$0xff] %vm1428_vm10, %v1427_v2 }

</bundles_post_ra>
